<compile_context>
chip_gen: v7x
topology: tpu7x:2x2x1
jax: 0.10.0
libtpu: 0.0.40
codegen_flags: <defaults>
</compile_context>

<pallas_src>
import math
import jax
import jax.numpy as jnp
from jax.experimental import pallas as pl
from jax.experimental.pallas import tpu as pltpu  # noqa: F401  (TPU backend assumed)

# --- model hyper-parameters (small, consistent with the module) -------------
N_VOCAB = 64
N_EMB = 32
N_HEADS = 4
N_HIDDEN = 64
N_LAYERS = 2
DROPOUT = 0.0          # inference -> dropout is identity
BATCH = 2
SEQ = 8
V_PAD = 128            # lane-dense padded vocab dim for the final store


# --- in-kernel helpers -------------------------------------------------------
def _layer_norm(x, w, b, eps=1e-5):
    mu = jnp.mean(x, axis=-1, keepdims=True)
    xc = x - mu
    var = jnp.mean(xc * xc, axis=-1, keepdims=True)
    return xc * jax.lax.rsqrt(var + eps) * w + b


# --- fused Pallas kernel ------------------------------------------------------
def fused_lm_kernel(ids_ref, emb_ref, pe_ref,
                    wqkv_ref, bqkv_ref, wo_ref, bo_ref,
                    ln1w_ref, ln1b_ref, w1_ref, b1_ref,
                    w2_ref, b2_ref, ln2w_ref, ln2b_ref,
                    wfc_ref, bfc_ref, o_ref):
    """Entire TransformerLM forward. Activations (B*S, E) stay in VMEM/vregs."""
    N, E = pe_ref.shape                # (B*S, E)
    V = emb_ref.shape[0]
    H = N_HEADS
    Dh = E // H
    S = SEQ
    B = N // S
    scale = 1.0 / math.sqrt(Dh)

    # --- embedding lookup (one-hot matmul, no gather) + positional encoding ---
    ids = ids_ref[...]                                            # (N, 1) int32
    onehot = (ids == jax.lax.broadcasted_iota(jnp.int32, (N, V), 1)
              ).astype(jnp.float32)                               # (N, V)
    x = jnp.dot(onehot, emb_ref[...],
                preferred_element_type=jnp.float32) + pe_ref[...]  # (N, E)

    # --- encoder layers, fully unrolled in Python ------------------------------
    for l in range(N_LAYERS):
        # fused QKV projection with pre-transposed (E, 3E) weight
        qkv = jnp.dot(x, wqkv_ref[l],
                      preferred_element_type=jnp.float32) + bqkv_ref[l]  # (N, 3E)
        q = qkv[:, :E] * scale
        k = qkv[:, E:2 * E]
        v = qkv[:, 2 * E:]

        wo_t = wo_ref[l]                                          # (E, E) (in, out)
        attn = None
        for h in range(H):
            # (N, Dh) lane slice -> (B, S, Dh): sublane-only split, layout-friendly
            qh = q[:, h * Dh:(h + 1) * Dh].reshape(B, S, Dh)
            kh = k[:, h * Dh:(h + 1) * Dh].reshape(B, S, Dh)
            vh = v[:, h * Dh:(h + 1) * Dh].reshape(B, S, Dh)
            s = jnp.einsum("bsd,btd->bst", qh, kh,
                           preferred_element_type=jnp.float32)    # (B, S, S)
            s = s - jnp.max(s, axis=-1, keepdims=True)
            p = jnp.exp(s)
            p = p * pl.reciprocal(jnp.sum(p, axis=-1, keepdims=True), approx=True)
            ctx = jnp.einsum("bst,btd->bsd", p, vh,
                             preferred_element_type=jnp.float32)  # (B, S, Dh)
            # accumulate output projection per head: sum_h ctx_h @ Wo_t[h-rows]
            part = jnp.dot(ctx.reshape(N, Dh), wo_t[h * Dh:(h + 1) * Dh, :],
                           preferred_element_type=jnp.float32)    # (N, E)
            attn = part if attn is None else attn + part
        attn = attn + bo_ref[l]

        x = _layer_norm(x + attn, ln1w_ref[l], ln1b_ref[l])

        ff = jnp.dot(x, w1_ref[l], preferred_element_type=jnp.float32) + b1_ref[l]
        ff = jnp.maximum(ff, 0.0)
        ff = jnp.dot(ff, w2_ref[l], preferred_element_type=jnp.float32) + b2_ref[l]
        x = _layer_norm(x + ff, ln2w_ref[l], ln2b_ref[l])

    # --- final vocab projection, lane-dense (V padded to 128) ------------------
    logits = jnp.dot(x, wfc_ref[...],
                     preferred_element_type=jnp.float32) + bfc_ref[...]  # (N, V_PAD)
    o_ref[...] = logits.astype(o_ref.dtype)


# --- host-side wrapper --------------------------------------------------------
def positional_encoding(S, E):
    pos = jnp.arange(S, dtype=jnp.float32)[:, None]
    div = jnp.exp(jnp.arange(0, E, 2, dtype=jnp.float32) * (-math.log(10000.0) / E))
    pe = jnp.zeros((S, E), jnp.float32)
    pe = pe.at[:, 0::2].set(jnp.sin(pos * div))
    pe = pe.at[:, 1::2].set(jnp.cos(pos * div))
    return pe


@jax.jit
def forward(ids, params):
    B, S = ids.shape
    ids2 = ids.reshape(B * S, 1).astype(jnp.int32)
    pe_full = jnp.tile(positional_encoding(S, N_EMB), (B, 1))     # (B*S, E)

    stack = lambda name: jnp.stack([lp[name] for lp in params["layers"]])
    # pre-transpose matmul weights to (in, out) on the host — no in-kernel .T
    wqkv_t = jnp.stack([lp["wqkv"].T for lp in params["layers"]])  # (L, E, 3E)
    wo_t = jnp.stack([lp["wo"].T for lp in params["layers"]])      # (L, E, E)
    w1_t = jnp.stack([lp["w1"].T for lp in params["layers"]])      # (L, E, H)
    w2_t = jnp.stack([lp["w2"].T for lp in params["layers"]])      # (L, H, E)

    wfc_pad = jnp.zeros((N_EMB, V_PAD), jnp.float32).at[:, :N_VOCAB].set(
        params["wfc"].T)
    bfc_pad = jnp.zeros((1, V_PAD), jnp.float32).at[:, :N_VOCAB].set(params["bfc"])

    logits_pad = pl.pallas_call(
        fused_lm_kernel,
        out_shape=jax.ShapeDtypeStruct((B * S, V_PAD), jnp.float32),
    )(ids2, params["emb"], pe_full,
      wqkv_t, stack("bqkv"), wo_t, stack("bo"),
      stack("ln1w"), stack("ln1b"), w1_t, stack("b1"),
      w2_t, stack("b2"), stack("ln2w"), stack("ln2b"),
      wfc_pad, bfc_pad)

    return logits_pad[:, :N_VOCAB].reshape(B, S, N_VOCAB)


# --- parameter init -----------------------------------------------------------
def init_params(key):
    n_keys = 2 + 6 * N_LAYERS
    keys = jax.random.split(key, n_keys)
    ki = iter(range(n_keys))
    std = 0.02

    params = {
        "emb": jax.random.normal(keys[next(ki)], (N_VOCAB, N_EMB), jnp.float32) * std,
        "wfc": jax.random.normal(keys[next(ki)], (N_VOCAB, N_EMB), jnp.float32) * std,
        "bfc": jnp.zeros((1, N_VOCAB), jnp.float32),
        "layers": [],
    }
    for _ in range(N_LAYERS):
        lp = {
            "wqkv": jax.random.normal(keys[next(ki)], (3 * N_EMB, N_EMB), jnp.float32) * std,
            "bqkv": jnp.zeros((1, 3 * N_EMB), jnp.float32),
            "wo": jax.random.normal(keys[next(ki)], (N_EMB, N_EMB), jnp.float32) * std,
            "bo": jnp.zeros((1, N_EMB), jnp.float32),
            "ln1w": jnp.ones((1, N_EMB), jnp.float32),
            "ln1b": jnp.zeros((1, N_EMB), jnp.float32),
            "w1": jax.random.normal(keys[next(ki)], (N_HIDDEN, N_EMB), jnp.float32) * std,
            "b1": jnp.zeros((1, N_HIDDEN), jnp.float32),
            "w2": jax.random.normal(keys[next(ki)], (N_EMB, N_HIDDEN), jnp.float32) * std,
            "b2": jnp.zeros((1, N_EMB), jnp.float32),
            "ln2w": jnp.ones((1, N_EMB), jnp.float32),
            "ln2b": jnp.zeros((1, N_EMB), jnp.float32),
        }
        # burn two extra keys so counting stays simple
        next(ki), next(ki)
        params["layers"].append(lp)
    return params


# --- pure-JAX reference for validation ----------------------------------------
def forward_ref(ids, params):
    def ln(x, w, b, eps=1e-5):
        mu = jnp.mean(x, -1, keepdims=True)
        var = jnp.mean((x - mu) ** 2, -1, keepdims=True)
        return (x - mu) / jnp.sqrt(var + eps) * w + b

    x = params["emb"][ids] + positional_encoding(ids.shape[1], N_EMB)[None]
    Dh = N_EMB // N_HEADS
    for lp in params["layers"]:
        qkv = x @ lp["wqkv"].T + lp["bqkv"]
        q, k, v = jnp.split(qkv, 3, axis=-1)
        B, S, _ = x.shape
        q = q.reshape(B, S, N_HEADS, Dh).transpose(0, 2, 1, 3)
        k = k.reshape(B, S, N_HEADS, Dh).transpose(0, 2, 1, 3)
        v = v.reshape(B, S, N_HEADS, Dh).transpose(0, 2, 1, 3)
        s = jnp.einsum("bhsd,bhtd->bhst", q, k) / math.sqrt(Dh)
        p = jax.nn.softmax(s, axis=-1)
        ctx = jnp.einsum("bhst,bhtd->bhsd", p, v).transpose(0, 2, 1, 3).reshape(B, S, N_EMB)
        attn = ctx @ lp["wo"].T + lp["bo"]
        x = ln(x + attn, lp["ln1w"], lp["ln1b"])
        ff = jnp.maximum(x @ lp["w1"].T + lp["b1"], 0.0) @ lp["w2"].T + lp["b2"]
        x = ln(x + ff, lp["ln2w"], lp["ln2b"])
    return x @ params["wfc"].T + params["bfc"]


if __name__ == "__main__":
    key = jax.random.PRNGKey(0)
    pkey, dkey = jax.random.split(key)
    params = init_params(pkey)
    ids = jax.random.randint(dkey, (BATCH, SEQ), 0, N_VOCAB, dtype=jnp.int32)

    logits = forward(ids, params)
    logits = jax.block_until_ready(logits)
    assert logits.shape == (BATCH, SEQ, N_VOCAB), logits.shape

    ref = jax.block_until_ready(forward_ref(ids, params))
    # tolerance slightly relaxed vs exact f32: softmax uses the EUP approx
    # reciprocal (pl.reciprocal(approx=True)), which introduces ~1e-4-level
    # relative differences.
    assert jnp.allclose(logits, ref, atol=1e-3, rtol=1e-3), \
        float(jnp.max(jnp.abs(logits - ref)))

    print("KERNEL_OK")
</pallas_src>

<mosaic_0001>
module attributes {stable_mosaic.version = 11 : i64} {
  func.func @fused_lm_kernel(%arg0: memref<16x1xi32, #tpu.memory_space<vmem>>, %arg1: memref<64x32xf32, #tpu.memory_space<vmem>>, %arg2: memref<16x32xf32, #tpu.memory_space<vmem>>, %arg3: memref<2x32x96xf32, #tpu.memory_space<vmem>>, %arg4: memref<2x1x96xf32, #tpu.memory_space<vmem>>, %arg5: memref<2x32x32xf32, #tpu.memory_space<vmem>>, %arg6: memref<2x1x32xf32, #tpu.memory_space<vmem>>, %arg7: memref<2x1x32xf32, #tpu.memory_space<vmem>>, %arg8: memref<2x1x32xf32, #tpu.memory_space<vmem>>, %arg9: memref<2x32x64xf32, #tpu.memory_space<vmem>>, %arg10: memref<2x1x64xf32, #tpu.memory_space<vmem>>, %arg11: memref<2x64x32xf32, #tpu.memory_space<vmem>>, %arg12: memref<2x1x32xf32, #tpu.memory_space<vmem>>, %arg13: memref<2x1x32xf32, #tpu.memory_space<vmem>>, %arg14: memref<2x1x32xf32, #tpu.memory_space<vmem>>, %arg15: memref<32x128xf32, #tpu.memory_space<vmem>>, %arg16: memref<1x128xf32, #tpu.memory_space<vmem>>, %arg17: memref<16x128xf32, #tpu.memory_space<vmem>>) attributes {dimension_semantics = [], scalar_prefetch = 0 : i64, scratch_operands = 0 : i64, tpu.core_type = #tpu.core_type<tc>} {
    %c0 = arith.constant 0 : index
    %c0_0 = arith.constant 0 : index
    %0 = vector.load %arg0[%c0, %c0_0] : memref<16x1xi32, #tpu.memory_space<vmem>>, vector<16x1xi32>
    %1 = tpu.iota {dimensions = array<i32: 1>} : vector<16x64xi32>
    %2 = vector.broadcast %0 : vector<16x1xi32> to vector<16x64xi32>
    %3 = arith.cmpi eq, %2, %1 : vector<16x64xi32>
    %4 = arith.extui %3 : vector<16x64xi1> to vector<16x64xi32>
    %5 = arith.sitofp %4 : vector<16x64xi32> to vector<16x64xf32>
    %c0_1 = arith.constant 0 : index
    %c0_2 = arith.constant 0 : index
    %6 = vector.load %arg1[%c0_1, %c0_2] : memref<64x32xf32, #tpu.memory_space<vmem>>, vector<64x32xf32>
    %cst = arith.constant dense<0.000000e+00> : vector<16x32xf32>
    %7 = tpu.matmul %5, %6, %cst {dimension_numbers = #tpu.dot_dimension_numbers<[1], [0], [0], [1], [0, 0, 1, 1], [], []>} : vector<16x64xf32>, vector<64x32xf32>, vector<16x32xf32> -> vector<16x32xf32>
    %c0_3 = arith.constant 0 : index
    %c0_4 = arith.constant 0 : index
    %8 = vector.load %arg2[%c0_3, %c0_4] : memref<16x32xf32, #tpu.memory_space<vmem>>, vector<16x32xf32>
    %9 = arith.addf %7, %8 : vector<16x32xf32>
    %c0_5 = arith.constant 0 : index
    %c0_6 = arith.constant 0 : index
    %c0_7 = arith.constant 0 : index
    %10 = vector.load %arg3[%c0_5, %c0_6, %c0_7] : memref<2x32x96xf32, #tpu.memory_space<vmem>>, vector<1x32x96xf32>
    %11 = vector.shape_cast %10 : vector<1x32x96xf32> to vector<32x96xf32>
    %cst_8 = arith.constant dense<0.000000e+00> : vector<16x96xf32>
    %12 = tpu.matmul %9, %11, %cst_8 {dimension_numbers = #tpu.dot_dimension_numbers<[1], [0], [0], [1], [0, 0, 1, 1], [], []>} : vector<16x32xf32>, vector<32x96xf32>, vector<16x96xf32> -> vector<16x96xf32>
    %c0_9 = arith.constant 0 : index
    %c0_10 = arith.constant 0 : index
    %c0_11 = arith.constant 0 : index
    %13 = vector.load %arg4[%c0_9, %c0_10, %c0_11] : memref<2x1x96xf32, #tpu.memory_space<vmem>>, vector<1x1x96xf32>
    %14 = vector.shape_cast %13 : vector<1x1x96xf32> to vector<1x96xf32>
    %15 = vector.broadcast %14 : vector<1x96xf32> to vector<16x96xf32>
    %16 = arith.addf %12, %15 : vector<16x96xf32>
    %17 = vector.extract_strided_slice %16 {offsets = [0, 0], sizes = [16, 32], strides = [1, 1]} : vector<16x96xf32> to vector<16x32xf32>
    %cst_12 = arith.constant 0.353553385 : f32
    %18 = vector.broadcast %cst_12 : f32 to vector<16x32xf32>
    %19 = arith.mulf %17, %18 : vector<16x32xf32>
    %20 = vector.extract_strided_slice %16 {offsets = [0, 32], sizes = [16, 32], strides = [1, 1]} : vector<16x96xf32> to vector<16x32xf32>
    %21 = vector.extract_strided_slice %16 {offsets = [0, 64], sizes = [16, 32], strides = [1, 1]} : vector<16x96xf32> to vector<16x32xf32>
    %c0_13 = arith.constant 0 : index
    %c0_14 = arith.constant 0 : index
    %c0_15 = arith.constant 0 : index
    %22 = vector.load %arg5[%c0_13, %c0_14, %c0_15] : memref<2x32x32xf32, #tpu.memory_space<vmem>>, vector<1x32x32xf32>
    %23 = vector.shape_cast %22 : vector<1x32x32xf32> to vector<32x32xf32>
    %24 = vector.extract_strided_slice %19 {offsets = [0, 0], sizes = [16, 8], strides = [1, 1]} : vector<16x32xf32> to vector<16x8xf32>
    %25 = vector.shape_cast %24 : vector<16x8xf32> to vector<2x8x8xf32>
    %26 = vector.extract_strided_slice %20 {offsets = [0, 0], sizes = [16, 8], strides = [1, 1]} : vector<16x32xf32> to vector<16x8xf32>
    %27 = vector.shape_cast %26 : vector<16x8xf32> to vector<2x8x8xf32>
    %28 = vector.extract_strided_slice %21 {offsets = [0, 0], sizes = [16, 8], strides = [1, 1]} : vector<16x32xf32> to vector<16x8xf32>
    %29 = vector.shape_cast %28 : vector<16x8xf32> to vector<2x8x8xf32>
    "tpu.trace_start"() <{level = 10 : i32, message = "bsd,btd->bst"}> : () -> ()
    %cst_16 = arith.constant dense<0.000000e+00> : vector<2x8x8xf32>
    %30 = tpu.matmul %25, %27, %cst_16 {dimension_numbers = #tpu.dot_dimension_numbers<[2], [2], [1], [1], [0, 0, 0, 1, 1, 1], [0], [0]>} : vector<2x8x8xf32>, vector<2x8x8xf32>, vector<2x8x8xf32> -> vector<2x8x8xf32>
    "tpu.trace_stop"() : () -> ()
    %cst_17 = arith.constant dense<0xFF800000> : vector<2x8xf32>
    %31 = vector.multi_reduction <maximumf>, %30, %cst_17 [2] : vector<2x8x8xf32> to vector<2x8xf32>
    %32 = vector.shape_cast %31 : vector<2x8xf32> to vector<2x8x1xf32>
    %33 = vector.broadcast %32 : vector<2x8x1xf32> to vector<2x8x8xf32>
    %34 = arith.subf %30, %33 : vector<2x8x8xf32>
    %35 = math.exp %34 : vector<2x8x8xf32>
    %cst_18 = arith.constant dense<0.000000e+00> : vector<2x8xf32>
    %36 = vector.multi_reduction <add>, %35, %cst_18 [2] : vector<2x8x8xf32> to vector<2x8xf32>
    %37 = vector.shape_cast %36 : vector<2x8xf32> to vector<2x8x1xf32>
    %38 = tpu.reciprocal %37 {approx = true} : vector<2x8x1xf32> -> vector<2x8x1xf32>
    %39 = vector.broadcast %38 : vector<2x8x1xf32> to vector<2x8x8xf32>
    %40 = arith.mulf %35, %39 : vector<2x8x8xf32>
    "tpu.trace_start"() <{level = 10 : i32, message = "bst,btd->bsd"}> : () -> ()
    %cst_19 = arith.constant dense<0.000000e+00> : vector<2x8x8xf32>
    %41 = tpu.matmul %40, %29, %cst_19 {dimension_numbers = #tpu.dot_dimension_numbers<[2], [1], [1], [2], [0, 0, 0, 1, 1, 2], [0], [0]>} : vector<2x8x8xf32>, vector<2x8x8xf32>, vector<2x8x8xf32> -> vector<2x8x8xf32>
    "tpu.trace_stop"() : () -> ()
    %42 = vector.shape_cast %41 : vector<2x8x8xf32> to vector<16x8xf32>
    %43 = vector.extract_strided_slice %23 {offsets = [0, 0], sizes = [8, 32], strides = [1, 1]} : vector<32x32xf32> to vector<8x32xf32>
    %cst_20 = arith.constant dense<0.000000e+00> : vector<16x32xf32>
    %44 = tpu.matmul %42, %43, %cst_20 {dimension_numbers = #tpu.dot_dimension_numbers<[1], [0], [0], [1], [0, 0, 1, 1], [], []>} : vector<16x8xf32>, vector<8x32xf32>, vector<16x32xf32> -> vector<16x32xf32>
    %45 = vector.extract_strided_slice %19 {offsets = [0, 8], sizes = [16, 8], strides = [1, 1]} : vector<16x32xf32> to vector<16x8xf32>
    %46 = vector.shape_cast %45 : vector<16x8xf32> to vector<2x8x8xf32>
    %47 = vector.extract_strided_slice %20 {offsets = [0, 8], sizes = [16, 8], strides = [1, 1]} : vector<16x32xf32> to vector<16x8xf32>
    %48 = vector.shape_cast %47 : vector<16x8xf32> to vector<2x8x8xf32>
    %49 = vector.extract_strided_slice %21 {offsets = [0, 8], sizes = [16, 8], strides = [1, 1]} : vector<16x32xf32> to vector<16x8xf32>
    %50 = vector.shape_cast %49 : vector<16x8xf32> to vector<2x8x8xf32>
    "tpu.trace_start"() <{level = 10 : i32, message = "bsd,btd->bst"}> : () -> ()
    %cst_21 = arith.constant dense<0.000000e+00> : vector<2x8x8xf32>
    %51 = tpu.matmul %46, %48, %cst_21 {dimension_numbers = #tpu.dot_dimension_numbers<[2], [2], [1], [1], [0, 0, 0, 1, 1, 1], [0], [0]>} : vector<2x8x8xf32>, vector<2x8x8xf32>, vector<2x8x8xf32> -> vector<2x8x8xf32>
    "tpu.trace_stop"() : () -> ()
    %cst_22 = arith.constant dense<0xFF800000> : vector<2x8xf32>
    %52 = vector.multi_reduction <maximumf>, %51, %cst_22 [2] : vector<2x8x8xf32> to vector<2x8xf32>
    %53 = vector.shape_cast %52 : vector<2x8xf32> to vector<2x8x1xf32>
    %54 = vector.broadcast %53 : vector<2x8x1xf32> to vector<2x8x8xf32>
    %55 = arith.subf %51, %54 : vector<2x8x8xf32>
    %56 = math.exp %55 : vector<2x8x8xf32>
    %cst_23 = arith.constant dense<0.000000e+00> : vector<2x8xf32>
    %57 = vector.multi_reduction <add>, %56, %cst_23 [2] : vector<2x8x8xf32> to vector<2x8xf32>
    %58 = vector.shape_cast %57 : vector<2x8xf32> to vector<2x8x1xf32>
    %59 = tpu.reciprocal %58 {approx = true} : vector<2x8x1xf32> -> vector<2x8x1xf32>
    %60 = vector.broadcast %59 : vector<2x8x1xf32> to vector<2x8x8xf32>
    %61 = arith.mulf %56, %60 : vector<2x8x8xf32>
    "tpu.trace_start"() <{level = 10 : i32, message = "bst,btd->bsd"}> : () -> ()
    %cst_24 = arith.constant dense<0.000000e+00> : vector<2x8x8xf32>
    %62 = tpu.matmul %61, %50, %cst_24 {dimension_numbers = #tpu.dot_dimension_numbers<[2], [1], [1], [2], [0, 0, 0, 1, 1, 2], [0], [0]>} : vector<2x8x8xf32>, vector<2x8x8xf32>, vector<2x8x8xf32> -> vector<2x8x8xf32>
    "tpu.trace_stop"() : () -> ()
    %63 = vector.shape_cast %62 : vector<2x8x8xf32> to vector<16x8xf32>
    %64 = vector.extract_strided_slice %23 {offsets = [8, 0], sizes = [8, 32], strides = [1, 1]} : vector<32x32xf32> to vector<8x32xf32>
    %cst_25 = arith.constant dense<0.000000e+00> : vector<16x32xf32>
    %65 = tpu.matmul %63, %64, %cst_25 {dimension_numbers = #tpu.dot_dimension_numbers<[1], [0], [0], [1], [0, 0, 1, 1], [], []>} : vector<16x8xf32>, vector<8x32xf32>, vector<16x32xf32> -> vector<16x32xf32>
    %66 = arith.addf %44, %65 : vector<16x32xf32>
    %67 = vector.extract_strided_slice %19 {offsets = [0, 16], sizes = [16, 8], strides = [1, 1]} : vector<16x32xf32> to vector<16x8xf32>
    %68 = vector.shape_cast %67 : vector<16x8xf32> to vector<2x8x8xf32>
    %69 = vector.extract_strided_slice %20 {offsets = [0, 16], sizes = [16, 8], strides = [1, 1]} : vector<16x32xf32> to vector<16x8xf32>
    %70 = vector.shape_cast %69 : vector<16x8xf32> to vector<2x8x8xf32>
    %71 = vector.extract_strided_slice %21 {offsets = [0, 16], sizes = [16, 8], strides = [1, 1]} : vector<16x32xf32> to vector<16x8xf32>
    %72 = vector.shape_cast %71 : vector<16x8xf32> to vector<2x8x8xf32>
    "tpu.trace_start"() <{level = 10 : i32, message = "bsd,btd->bst"}> : () -> ()
    %cst_26 = arith.constant dense<0.000000e+00> : vector<2x8x8xf32>
    %73 = tpu.matmul %68, %70, %cst_26 {dimension_numbers = #tpu.dot_dimension_numbers<[2], [2], [1], [1], [0, 0, 0, 1, 1, 1], [0], [0]>} : vector<2x8x8xf32>, vector<2x8x8xf32>, vector<2x8x8xf32> -> vector<2x8x8xf32>
    "tpu.trace_stop"() : () -> ()
    %cst_27 = arith.constant dense<0xFF800000> : vector<2x8xf32>
    %74 = vector.multi_reduction <maximumf>, %73, %cst_27 [2] : vector<2x8x8xf32> to vector<2x8xf32>
    %75 = vector.shape_cast %74 : vector<2x8xf32> to vector<2x8x1xf32>
    %76 = vector.broadcast %75 : vector<2x8x1xf32> to vector<2x8x8xf32>
    %77 = arith.subf %73, %76 : vector<2x8x8xf32>
    %78 = math.exp %77 : vector<2x8x8xf32>
    %cst_28 = arith.constant dense<0.000000e+00> : vector<2x8xf32>
    %79 = vector.multi_reduction <add>, %78, %cst_28 [2] : vector<2x8x8xf32> to vector<2x8xf32>
    %80 = vector.shape_cast %79 : vector<2x8xf32> to vector<2x8x1xf32>
    %81 = tpu.reciprocal %80 {approx = true} : vector<2x8x1xf32> -> vector<2x8x1xf32>
    %82 = vector.broadcast %81 : vector<2x8x1xf32> to vector<2x8x8xf32>
    %83 = arith.mulf %78, %82 : vector<2x8x8xf32>
    "tpu.trace_start"() <{level = 10 : i32, message = "bst,btd->bsd"}> : () -> ()
    %cst_29 = arith.constant dense<0.000000e+00> : vector<2x8x8xf32>
    %84 = tpu.matmul %83, %72, %cst_29 {dimension_numbers = #tpu.dot_dimension_numbers<[2], [1], [1], [2], [0, 0, 0, 1, 1, 2], [0], [0]>} : vector<2x8x8xf32>, vector<2x8x8xf32>, vector<2x8x8xf32> -> vector<2x8x8xf32>
    "tpu.trace_stop"() : () -> ()
    %85 = vector.shape_cast %84 : vector<2x8x8xf32> to vector<16x8xf32>
    %86 = vector.extract_strided_slice %23 {offsets = [16, 0], sizes = [8, 32], strides = [1, 1]} : vector<32x32xf32> to vector<8x32xf32>
    %cst_30 = arith.constant dense<0.000000e+00> : vector<16x32xf32>
    %87 = tpu.matmul %85, %86, %cst_30 {dimension_numbers = #tpu.dot_dimension_numbers<[1], [0], [0], [1], [0, 0, 1, 1], [], []>} : vector<16x8xf32>, vector<8x32xf32>, vector<16x32xf32> -> vector<16x32xf32>
    %88 = arith.addf %66, %87 : vector<16x32xf32>
    %89 = vector.extract_strided_slice %19 {offsets = [0, 24], sizes = [16, 8], strides = [1, 1]} : vector<16x32xf32> to vector<16x8xf32>
    %90 = vector.shape_cast %89 : vector<16x8xf32> to vector<2x8x8xf32>
    %91 = vector.extract_strided_slice %20 {offsets = [0, 24], sizes = [16, 8], strides = [1, 1]} : vector<16x32xf32> to vector<16x8xf32>
    %92 = vector.shape_cast %91 : vector<16x8xf32> to vector<2x8x8xf32>
    %93 = vector.extract_strided_slice %21 {offsets = [0, 24], sizes = [16, 8], strides = [1, 1]} : vector<16x32xf32> to vector<16x8xf32>
    %94 = vector.shape_cast %93 : vector<16x8xf32> to vector<2x8x8xf32>
    "tpu.trace_start"() <{level = 10 : i32, message = "bsd,btd->bst"}> : () -> ()
    %cst_31 = arith.constant dense<0.000000e+00> : vector<2x8x8xf32>
    %95 = tpu.matmul %90, %92, %cst_31 {dimension_numbers = #tpu.dot_dimension_numbers<[2], [2], [1], [1], [0, 0, 0, 1, 1, 1], [0], [0]>} : vector<2x8x8xf32>, vector<2x8x8xf32>, vector<2x8x8xf32> -> vector<2x8x8xf32>
    "tpu.trace_stop"() : () -> ()
    %cst_32 = arith.constant dense<0xFF800000> : vector<2x8xf32>
    %96 = vector.multi_reduction <maximumf>, %95, %cst_32 [2] : vector<2x8x8xf32> to vector<2x8xf32>
    %97 = vector.shape_cast %96 : vector<2x8xf32> to vector<2x8x1xf32>
    %98 = vector.broadcast %97 : vector<2x8x1xf32> to vector<2x8x8xf32>
    %99 = arith.subf %95, %98 : vector<2x8x8xf32>
    %100 = math.exp %99 : vector<2x8x8xf32>
    %cst_33 = arith.constant dense<0.000000e+00> : vector<2x8xf32>
    %101 = vector.multi_reduction <add>, %100, %cst_33 [2] : vector<2x8x8xf32> to vector<2x8xf32>
    %102 = vector.shape_cast %101 : vector<2x8xf32> to vector<2x8x1xf32>
    %103 = tpu.reciprocal %102 {approx = true} : vector<2x8x1xf32> -> vector<2x8x1xf32>
    %104 = vector.broadcast %103 : vector<2x8x1xf32> to vector<2x8x8xf32>
    %105 = arith.mulf %100, %104 : vector<2x8x8xf32>
    "tpu.trace_start"() <{level = 10 : i32, message = "bst,btd->bsd"}> : () -> ()
    %cst_34 = arith.constant dense<0.000000e+00> : vector<2x8x8xf32>
    %106 = tpu.matmul %105, %94, %cst_34 {dimension_numbers = #tpu.dot_dimension_numbers<[2], [1], [1], [2], [0, 0, 0, 1, 1, 2], [0], [0]>} : vector<2x8x8xf32>, vector<2x8x8xf32>, vector<2x8x8xf32> -> vector<2x8x8xf32>
    "tpu.trace_stop"() : () -> ()
    %107 = vector.shape_cast %106 : vector<2x8x8xf32> to vector<16x8xf32>
    %108 = vector.extract_strided_slice %23 {offsets = [24, 0], sizes = [8, 32], strides = [1, 1]} : vector<32x32xf32> to vector<8x32xf32>
    %cst_35 = arith.constant dense<0.000000e+00> : vector<16x32xf32>
    %109 = tpu.matmul %107, %108, %cst_35 {dimension_numbers = #tpu.dot_dimension_numbers<[1], [0], [0], [1], [0, 0, 1, 1], [], []>} : vector<16x8xf32>, vector<8x32xf32>, vector<16x32xf32> -> vector<16x32xf32>
    %110 = arith.addf %88, %109 : vector<16x32xf32>
    %c0_36 = arith.constant 0 : index
    %c0_37 = arith.constant 0 : index
    %c0_38 = arith.constant 0 : index
    %111 = vector.load %arg6[%c0_36, %c0_37, %c0_38] : memref<2x1x32xf32, #tpu.memory_space<vmem>>, vector<1x1x32xf32>
    %112 = vector.shape_cast %111 : vector<1x1x32xf32> to vector<1x32xf32>
    %113 = vector.broadcast %112 : vector<1x32xf32> to vector<16x32xf32>
    %114 = arith.addf %110, %113 : vector<16x32xf32>
    %115 = arith.addf %9, %114 : vector<16x32xf32>
    %c0_39 = arith.constant 0 : index
    %c0_40 = arith.constant 0 : index
    %c0_41 = arith.constant 0 : index
    %116 = vector.load %arg7[%c0_39, %c0_40, %c0_41] : memref<2x1x32xf32, #tpu.memory_space<vmem>>, vector<1x1x32xf32>
    %117 = vector.shape_cast %116 : vector<1x1x32xf32> to vector<1x32xf32>
    %c0_42 = arith.constant 0 : index
    %c0_43 = arith.constant 0 : index
    %c0_44 = arith.constant 0 : index
    %118 = vector.load %arg8[%c0_42, %c0_43, %c0_44] : memref<2x1x32xf32, #tpu.memory_space<vmem>>, vector<1x1x32xf32>
    %119 = vector.shape_cast %118 : vector<1x1x32xf32> to vector<1x32xf32>
    %cst_45 = arith.constant dense<0.000000e+00> : vector<16xf32>
    %120 = vector.multi_reduction <add>, %115, %cst_45 [1] : vector<16x32xf32> to vector<16xf32>
    %121 = vector.shape_cast %120 : vector<16xf32> to vector<16x1xf32>
    %cst_46 = arith.constant 3.200000e+01 : f32
    %122 = vector.broadcast %cst_46 : f32 to vector<16x1xf32>
    %123 = arith.divf %121, %122 : vector<16x1xf32>
    %124 = vector.broadcast %123 : vector<16x1xf32> to vector<16x32xf32>
    %125 = arith.subf %115, %124 : vector<16x32xf32>
    %126 = arith.mulf %125, %125 : vector<16x32xf32>
    %cst_47 = arith.constant dense<0.000000e+00> : vector<16xf32>
    %127 = vector.multi_reduction <add>, %126, %cst_47 [1] : vector<16x32xf32> to vector<16xf32>
    %128 = vector.shape_cast %127 : vector<16xf32> to vector<16x1xf32>
    %cst_48 = arith.constant 3.200000e+01 : f32
    %129 = vector.broadcast %cst_48 : f32 to vector<16x1xf32>
    %130 = arith.divf %128, %129 : vector<16x1xf32>
    %cst_49 = arith.constant 9.99999974E-6 : f32
    %131 = vector.broadcast %cst_49 : f32 to vector<16x1xf32>
    %132 = arith.addf %130, %131 : vector<16x1xf32>
    %133 = math.rsqrt %132 : vector<16x1xf32>
    %134 = vector.broadcast %133 : vector<16x1xf32> to vector<16x32xf32>
    %135 = arith.mulf %125, %134 : vector<16x32xf32>
    %136 = vector.broadcast %117 : vector<1x32xf32> to vector<16x32xf32>
    %137 = arith.mulf %135, %136 : vector<16x32xf32>
    %138 = vector.broadcast %119 : vector<1x32xf32> to vector<16x32xf32>
    %139 = arith.addf %137, %138 : vector<16x32xf32>
    %c0_50 = arith.constant 0 : index
    %c0_51 = arith.constant 0 : index
    %c0_52 = arith.constant 0 : index
    %140 = vector.load %arg9[%c0_50, %c0_51, %c0_52] : memref<2x32x64xf32, #tpu.memory_space<vmem>>, vector<1x32x64xf32>
    %141 = vector.shape_cast %140 : vector<1x32x64xf32> to vector<32x64xf32>
    %cst_53 = arith.constant dense<0.000000e+00> : vector<16x64xf32>
    %142 = tpu.matmul %139, %141, %cst_53 {dimension_numbers = #tpu.dot_dimension_numbers<[1], [0], [0], [1], [0, 0, 1, 1], [], []>} : vector<16x32xf32>, vector<32x64xf32>, vector<16x64xf32> -> vector<16x64xf32>
    %c0_54 = arith.constant 0 : index
    %c0_55 = arith.constant 0 : index
    %c0_56 = arith.constant 0 : index
    %143 = vector.load %arg10[%c0_54, %c0_55, %c0_56] : memref<2x1x64xf32, #tpu.memory_space<vmem>>, vector<1x1x64xf32>
    %144 = vector.shape_cast %143 : vector<1x1x64xf32> to vector<1x64xf32>
    %145 = vector.broadcast %144 : vector<1x64xf32> to vector<16x64xf32>
    %146 = arith.addf %142, %145 : vector<16x64xf32>
    %cst_57 = arith.constant 0.000000e+00 : f32
    %147 = vector.broadcast %cst_57 : f32 to vector<16x64xf32>
    %148 = arith.maximumf %146, %147 : vector<16x64xf32>
    %c0_58 = arith.constant 0 : index
    %c0_59 = arith.constant 0 : index
    %c0_60 = arith.constant 0 : index
    %149 = vector.load %arg11[%c0_58, %c0_59, %c0_60] : memref<2x64x32xf32, #tpu.memory_space<vmem>>, vector<1x64x32xf32>
    %150 = vector.shape_cast %149 : vector<1x64x32xf32> to vector<64x32xf32>
    %cst_61 = arith.constant dense<0.000000e+00> : vector<16x32xf32>
    %151 = tpu.matmul %148, %150, %cst_61 {dimension_numbers = #tpu.dot_dimension_numbers<[1], [0], [0], [1], [0, 0, 1, 1], [], []>} : vector<16x64xf32>, vector<64x32xf32>, vector<16x32xf32> -> vector<16x32xf32>
    %c0_62 = arith.constant 0 : index
    %c0_63 = arith.constant 0 : index
    %c0_64 = arith.constant 0 : index
    %152 = vector.load %arg12[%c0_62, %c0_63, %c0_64] : memref<2x1x32xf32, #tpu.memory_space<vmem>>, vector<1x1x32xf32>
    %153 = vector.shape_cast %152 : vector<1x1x32xf32> to vector<1x32xf32>
    %154 = vector.broadcast %153 : vector<1x32xf32> to vector<16x32xf32>
    %155 = arith.addf %151, %154 : vector<16x32xf32>
    %156 = arith.addf %139, %155 : vector<16x32xf32>
    %c0_65 = arith.constant 0 : index
    %c0_66 = arith.constant 0 : index
    %c0_67 = arith.constant 0 : index
    %157 = vector.load %arg13[%c0_65, %c0_66, %c0_67] : memref<2x1x32xf32, #tpu.memory_space<vmem>>, vector<1x1x32xf32>
    %158 = vector.shape_cast %157 : vector<1x1x32xf32> to vector<1x32xf32>
    %c0_68 = arith.constant 0 : index
    %c0_69 = arith.constant 0 : index
    %c0_70 = arith.constant 0 : index
    %159 = vector.load %arg14[%c0_68, %c0_69, %c0_70] : memref<2x1x32xf32, #tpu.memory_space<vmem>>, vector<1x1x32xf32>
    %160 = vector.shape_cast %159 : vector<1x1x32xf32> to vector<1x32xf32>
    %cst_71 = arith.constant dense<0.000000e+00> : vector<16xf32>
    %161 = vector.multi_reduction <add>, %156, %cst_71 [1] : vector<16x32xf32> to vector<16xf32>
    %162 = vector.shape_cast %161 : vector<16xf32> to vector<16x1xf32>
    %cst_72 = arith.constant 3.200000e+01 : f32
    %163 = vector.broadcast %cst_72 : f32 to vector<16x1xf32>
    %164 = arith.divf %162, %163 : vector<16x1xf32>
    %165 = vector.broadcast %164 : vector<16x1xf32> to vector<16x32xf32>
    %166 = arith.subf %156, %165 : vector<16x32xf32>
    %167 = arith.mulf %166, %166 : vector<16x32xf32>
    %cst_73 = arith.constant dense<0.000000e+00> : vector<16xf32>
    %168 = vector.multi_reduction <add>, %167, %cst_73 [1] : vector<16x32xf32> to vector<16xf32>
    %169 = vector.shape_cast %168 : vector<16xf32> to vector<16x1xf32>
    %cst_74 = arith.constant 3.200000e+01 : f32
    %170 = vector.broadcast %cst_74 : f32 to vector<16x1xf32>
    %171 = arith.divf %169, %170 : vector<16x1xf32>
    %cst_75 = arith.constant 9.99999974E-6 : f32
    %172 = vector.broadcast %cst_75 : f32 to vector<16x1xf32>
    %173 = arith.addf %171, %172 : vector<16x1xf32>
    %174 = math.rsqrt %173 : vector<16x1xf32>
    %175 = vector.broadcast %174 : vector<16x1xf32> to vector<16x32xf32>
    %176 = arith.mulf %166, %175 : vector<16x32xf32>
    %177 = vector.broadcast %158 : vector<1x32xf32> to vector<16x32xf32>
    %178 = arith.mulf %176, %177 : vector<16x32xf32>
    %179 = vector.broadcast %160 : vector<1x32xf32> to vector<16x32xf32>
    %180 = arith.addf %178, %179 : vector<16x32xf32>
    %c1 = arith.constant 1 : index
    %c0_76 = arith.constant 0 : index
    %c0_77 = arith.constant 0 : index
    %181 = vector.load %arg3[%c1, %c0_76, %c0_77] : memref<2x32x96xf32, #tpu.memory_space<vmem>>, vector<1x32x96xf32>
    %182 = vector.shape_cast %181 : vector<1x32x96xf32> to vector<32x96xf32>
    %cst_78 = arith.constant dense<0.000000e+00> : vector<16x96xf32>
    %183 = tpu.matmul %180, %182, %cst_78 {dimension_numbers = #tpu.dot_dimension_numbers<[1], [0], [0], [1], [0, 0, 1, 1], [], []>} : vector<16x32xf32>, vector<32x96xf32>, vector<16x96xf32> -> vector<16x96xf32>
    %c1_79 = arith.constant 1 : index
    %c0_80 = arith.constant 0 : index
    %c0_81 = arith.constant 0 : index
    %184 = vector.load %arg4[%c1_79, %c0_80, %c0_81] : memref<2x1x96xf32, #tpu.memory_space<vmem>>, vector<1x1x96xf32>
    %185 = vector.shape_cast %184 : vector<1x1x96xf32> to vector<1x96xf32>
    %186 = vector.broadcast %185 : vector<1x96xf32> to vector<16x96xf32>
    %187 = arith.addf %183, %186 : vector<16x96xf32>
    %188 = vector.extract_strided_slice %187 {offsets = [0, 0], sizes = [16, 32], strides = [1, 1]} : vector<16x96xf32> to vector<16x32xf32>
    %cst_82 = arith.constant 0.353553385 : f32
    %189 = vector.broadcast %cst_82 : f32 to vector<16x32xf32>
    %190 = arith.mulf %188, %189 : vector<16x32xf32>
    %191 = vector.extract_strided_slice %187 {offsets = [0, 32], sizes = [16, 32], strides = [1, 1]} : vector<16x96xf32> to vector<16x32xf32>
    %192 = vector.extract_strided_slice %187 {offsets = [0, 64], sizes = [16, 32], strides = [1, 1]} : vector<16x96xf32> to vector<16x32xf32>
    %c1_83 = arith.constant 1 : index
    %c0_84 = arith.constant 0 : index
    %c0_85 = arith.constant 0 : index
    %193 = vector.load %arg5[%c1_83, %c0_84, %c0_85] : memref<2x32x32xf32, #tpu.memory_space<vmem>>, vector<1x32x32xf32>
    %194 = vector.shape_cast %193 : vector<1x32x32xf32> to vector<32x32xf32>
    %195 = vector.extract_strided_slice %190 {offsets = [0, 0], sizes = [16, 8], strides = [1, 1]} : vector<16x32xf32> to vector<16x8xf32>
    %196 = vector.shape_cast %195 : vector<16x8xf32> to vector<2x8x8xf32>
    %197 = vector.extract_strided_slice %191 {offsets = [0, 0], sizes = [16, 8], strides = [1, 1]} : vector<16x32xf32> to vector<16x8xf32>
    %198 = vector.shape_cast %197 : vector<16x8xf32> to vector<2x8x8xf32>
    %199 = vector.extract_strided_slice %192 {offsets = [0, 0], sizes = [16, 8], strides = [1, 1]} : vector<16x32xf32> to vector<16x8xf32>
    %200 = vector.shape_cast %199 : vector<16x8xf32> to vector<2x8x8xf32>
    "tpu.trace_start"() <{level = 10 : i32, message = "bsd,btd->bst"}> : () -> ()
    %cst_86 = arith.constant dense<0.000000e+00> : vector<2x8x8xf32>
    %201 = tpu.matmul %196, %198, %cst_86 {dimension_numbers = #tpu.dot_dimension_numbers<[2], [2], [1], [1], [0, 0, 0, 1, 1, 1], [0], [0]>} : vector<2x8x8xf32>, vector<2x8x8xf32>, vector<2x8x8xf32> -> vector<2x8x8xf32>
    "tpu.trace_stop"() : () -> ()
    %cst_87 = arith.constant dense<0xFF800000> : vector<2x8xf32>
    %202 = vector.multi_reduction <maximumf>, %201, %cst_87 [2] : vector<2x8x8xf32> to vector<2x8xf32>
    %203 = vector.shape_cast %202 : vector<2x8xf32> to vector<2x8x1xf32>
    %204 = vector.broadcast %203 : vector<2x8x1xf32> to vector<2x8x8xf32>
    %205 = arith.subf %201, %204 : vector<2x8x8xf32>
    %206 = math.exp %205 : vector<2x8x8xf32>
    %cst_88 = arith.constant dense<0.000000e+00> : vector<2x8xf32>
    %207 = vector.multi_reduction <add>, %206, %cst_88 [2] : vector<2x8x8xf32> to vector<2x8xf32>
    %208 = vector.shape_cast %207 : vector<2x8xf32> to vector<2x8x1xf32>
    %209 = tpu.reciprocal %208 {approx = true} : vector<2x8x1xf32> -> vector<2x8x1xf32>
    %210 = vector.broadcast %209 : vector<2x8x1xf32> to vector<2x8x8xf32>
    %211 = arith.mulf %206, %210 : vector<2x8x8xf32>
    "tpu.trace_start"() <{level = 10 : i32, message = "bst,btd->bsd"}> : () -> ()
    %cst_89 = arith.constant dense<0.000000e+00> : vector<2x8x8xf32>
    %212 = tpu.matmul %211, %200, %cst_89 {dimension_numbers = #tpu.dot_dimension_numbers<[2], [1], [1], [2], [0, 0, 0, 1, 1, 2], [0], [0]>} : vector<2x8x8xf32>, vector<2x8x8xf32>, vector<2x8x8xf32> -> vector<2x8x8xf32>
    "tpu.trace_stop"() : () -> ()
    %213 = vector.shape_cast %212 : vector<2x8x8xf32> to vector<16x8xf32>
    %214 = vector.extract_strided_slice %194 {offsets = [0, 0], sizes = [8, 32], strides = [1, 1]} : vector<32x32xf32> to vector<8x32xf32>
    %cst_90 = arith.constant dense<0.000000e+00> : vector<16x32xf32>
    %215 = tpu.matmul %213, %214, %cst_90 {dimension_numbers = #tpu.dot_dimension_numbers<[1], [0], [0], [1], [0, 0, 1, 1], [], []>} : vector<16x8xf32>, vector<8x32xf32>, vector<16x32xf32> -> vector<16x32xf32>
    %216 = vector.extract_strided_slice %190 {offsets = [0, 8], sizes = [16, 8], strides = [1, 1]} : vector<16x32xf32> to vector<16x8xf32>
    %217 = vector.shape_cast %216 : vector<16x8xf32> to vector<2x8x8xf32>
    %218 = vector.extract_strided_slice %191 {offsets = [0, 8], sizes = [16, 8], strides = [1, 1]} : vector<16x32xf32> to vector<16x8xf32>
    %219 = vector.shape_cast %218 : vector<16x8xf32> to vector<2x8x8xf32>
    %220 = vector.extract_strided_slice %192 {offsets = [0, 8], sizes = [16, 8], strides = [1, 1]} : vector<16x32xf32> to vector<16x8xf32>
    %221 = vector.shape_cast %220 : vector<16x8xf32> to vector<2x8x8xf32>
    "tpu.trace_start"() <{level = 10 : i32, message = "bsd,btd->bst"}> : () -> ()
    %cst_91 = arith.constant dense<0.000000e+00> : vector<2x8x8xf32>
    %222 = tpu.matmul %217, %219, %cst_91 {dimension_numbers = #tpu.dot_dimension_numbers<[2], [2], [1], [1], [0, 0, 0, 1, 1, 1], [0], [0]>} : vector<2x8x8xf32>, vector<2x8x8xf32>, vector<2x8x8xf32> -> vector<2x8x8xf32>
    "tpu.trace_stop"() : () -> ()
    %cst_92 = arith.constant dense<0xFF800000> : vector<2x8xf32>
    %223 = vector.multi_reduction <maximumf>, %222, %cst_92 [2] : vector<2x8x8xf32> to vector<2x8xf32>
    %224 = vector.shape_cast %223 : vector<2x8xf32> to vector<2x8x1xf32>
    %225 = vector.broadcast %224 : vector<2x8x1xf32> to vector<2x8x8xf32>
    %226 = arith.subf %222, %225 : vector<2x8x8xf32>
    %227 = math.exp %226 : vector<2x8x8xf32>
    %cst_93 = arith.constant dense<0.000000e+00> : vector<2x8xf32>
    %228 = vector.multi_reduction <add>, %227, %cst_93 [2] : vector<2x8x8xf32> to vector<2x8xf32>
    %229 = vector.shape_cast %228 : vector<2x8xf32> to vector<2x8x1xf32>
    %230 = tpu.reciprocal %229 {approx = true} : vector<2x8x1xf32> -> vector<2x8x1xf32>
    %231 = vector.broadcast %230 : vector<2x8x1xf32> to vector<2x8x8xf32>
    %232 = arith.mulf %227, %231 : vector<2x8x8xf32>
    "tpu.trace_start"() <{level = 10 : i32, message = "bst,btd->bsd"}> : () -> ()
    %cst_94 = arith.constant dense<0.000000e+00> : vector<2x8x8xf32>
    %233 = tpu.matmul %232, %221, %cst_94 {dimension_numbers = #tpu.dot_dimension_numbers<[2], [1], [1], [2], [0, 0, 0, 1, 1, 2], [0], [0]>} : vector<2x8x8xf32>, vector<2x8x8xf32>, vector<2x8x8xf32> -> vector<2x8x8xf32>
    "tpu.trace_stop"() : () -> ()
    %234 = vector.shape_cast %233 : vector<2x8x8xf32> to vector<16x8xf32>
    %235 = vector.extract_strided_slice %194 {offsets = [8, 0], sizes = [8, 32], strides = [1, 1]} : vector<32x32xf32> to vector<8x32xf32>
    %cst_95 = arith.constant dense<0.000000e+00> : vector<16x32xf32>
    %236 = tpu.matmul %234, %235, %cst_95 {dimension_numbers = #tpu.dot_dimension_numbers<[1], [0], [0], [1], [0, 0, 1, 1], [], []>} : vector<16x8xf32>, vector<8x32xf32>, vector<16x32xf32> -> vector<16x32xf32>
    %237 = arith.addf %215, %236 : vector<16x32xf32>
    %238 = vector.extract_strided_slice %190 {offsets = [0, 16], sizes = [16, 8], strides = [1, 1]} : vector<16x32xf32> to vector<16x8xf32>
    %239 = vector.shape_cast %238 : vector<16x8xf32> to vector<2x8x8xf32>
    %240 = vector.extract_strided_slice %191 {offsets = [0, 16], sizes = [16, 8], strides = [1, 1]} : vector<16x32xf32> to vector<16x8xf32>
    %241 = vector.shape_cast %240 : vector<16x8xf32> to vector<2x8x8xf32>
    %242 = vector.extract_strided_slice %192 {offsets = [0, 16], sizes = [16, 8], strides = [1, 1]} : vector<16x32xf32> to vector<16x8xf32>
    %243 = vector.shape_cast %242 : vector<16x8xf32> to vector<2x8x8xf32>
    "tpu.trace_start"() <{level = 10 : i32, message = "bsd,btd->bst"}> : () -> ()
    %cst_96 = arith.constant dense<0.000000e+00> : vector<2x8x8xf32>
    %244 = tpu.matmul %239, %241, %cst_96 {dimension_numbers = #tpu.dot_dimension_numbers<[2], [2], [1], [1], [0, 0, 0, 1, 1, 1], [0], [0]>} : vector<2x8x8xf32>, vector<2x8x8xf32>, vector<2x8x8xf32> -> vector<2x8x8xf32>
    "tpu.trace_stop"() : () -> ()
    %cst_97 = arith.constant dense<0xFF800000> : vector<2x8xf32>
    %245 = vector.multi_reduction <maximumf>, %244, %cst_97 [2] : vector<2x8x8xf32> to vector<2x8xf32>
    %246 = vector.shape_cast %245 : vector<2x8xf32> to vector<2x8x1xf32>
    %247 = vector.broadcast %246 : vector<2x8x1xf32> to vector<2x8x8xf32>
    %248 = arith.subf %244, %247 : vector<2x8x8xf32>
    %249 = math.exp %248 : vector<2x8x8xf32>
    %cst_98 = arith.constant dense<0.000000e+00> : vector<2x8xf32>
    %250 = vector.multi_reduction <add>, %249, %cst_98 [2] : vector<2x8x8xf32> to vector<2x8xf32>
    %251 = vector.shape_cast %250 : vector<2x8xf32> to vector<2x8x1xf32>
    %252 = tpu.reciprocal %251 {approx = true} : vector<2x8x1xf32> -> vector<2x8x1xf32>
    %253 = vector.broadcast %252 : vector<2x8x1xf32> to vector<2x8x8xf32>
    %254 = arith.mulf %249, %253 : vector<2x8x8xf32>
    "tpu.trace_start"() <{level = 10 : i32, message = "bst,btd->bsd"}> : () -> ()
    %cst_99 = arith.constant dense<0.000000e+00> : vector<2x8x8xf32>
    %255 = tpu.matmul %254, %243, %cst_99 {dimension_numbers = #tpu.dot_dimension_numbers<[2], [1], [1], [2], [0, 0, 0, 1, 1, 2], [0], [0]>} : vector<2x8x8xf32>, vector<2x8x8xf32>, vector<2x8x8xf32> -> vector<2x8x8xf32>
    "tpu.trace_stop"() : () -> ()
    %256 = vector.shape_cast %255 : vector<2x8x8xf32> to vector<16x8xf32>
    %257 = vector.extract_strided_slice %194 {offsets = [16, 0], sizes = [8, 32], strides = [1, 1]} : vector<32x32xf32> to vector<8x32xf32>
    %cst_100 = arith.constant dense<0.000000e+00> : vector<16x32xf32>
    %258 = tpu.matmul %256, %257, %cst_100 {dimension_numbers = #tpu.dot_dimension_numbers<[1], [0], [0], [1], [0, 0, 1, 1], [], []>} : vector<16x8xf32>, vector<8x32xf32>, vector<16x32xf32> -> vector<16x32xf32>
    %259 = arith.addf %237, %258 : vector<16x32xf32>
    %260 = vector.extract_strided_slice %190 {offsets = [0, 24], sizes = [16, 8], strides = [1, 1]} : vector<16x32xf32> to vector<16x8xf32>
    %261 = vector.shape_cast %260 : vector<16x8xf32> to vector<2x8x8xf32>
    %262 = vector.extract_strided_slice %191 {offsets = [0, 24], sizes = [16, 8], strides = [1, 1]} : vector<16x32xf32> to vector<16x8xf32>
    %263 = vector.shape_cast %262 : vector<16x8xf32> to vector<2x8x8xf32>
    %264 = vector.extract_strided_slice %192 {offsets = [0, 24], sizes = [16, 8], strides = [1, 1]} : vector<16x32xf32> to vector<16x8xf32>
    %265 = vector.shape_cast %264 : vector<16x8xf32> to vector<2x8x8xf32>
    "tpu.trace_start"() <{level = 10 : i32, message = "bsd,btd->bst"}> : () -> ()
    %cst_101 = arith.constant dense<0.000000e+00> : vector<2x8x8xf32>
    %266 = tpu.matmul %261, %263, %cst_101 {dimension_numbers = #tpu.dot_dimension_numbers<[2], [2], [1], [1], [0, 0, 0, 1, 1, 1], [0], [0]>} : vector<2x8x8xf32>, vector<2x8x8xf32>, vector<2x8x8xf32> -> vector<2x8x8xf32>
    "tpu.trace_stop"() : () -> ()
    %cst_102 = arith.constant dense<0xFF800000> : vector<2x8xf32>
    %267 = vector.multi_reduction <maximumf>, %266, %cst_102 [2] : vector<2x8x8xf32> to vector<2x8xf32>
    %268 = vector.shape_cast %267 : vector<2x8xf32> to vector<2x8x1xf32>
    %269 = vector.broadcast %268 : vector<2x8x1xf32> to vector<2x8x8xf32>
    %270 = arith.subf %266, %269 : vector<2x8x8xf32>
    %271 = math.exp %270 : vector<2x8x8xf32>
    %cst_103 = arith.constant dense<0.000000e+00> : vector<2x8xf32>
    %272 = vector.multi_reduction <add>, %271, %cst_103 [2] : vector<2x8x8xf32> to vector<2x8xf32>
    %273 = vector.shape_cast %272 : vector<2x8xf32> to vector<2x8x1xf32>
    %274 = tpu.reciprocal %273 {approx = true} : vector<2x8x1xf32> -> vector<2x8x1xf32>
    %275 = vector.broadcast %274 : vector<2x8x1xf32> to vector<2x8x8xf32>
    %276 = arith.mulf %271, %275 : vector<2x8x8xf32>
    "tpu.trace_start"() <{level = 10 : i32, message = "bst,btd->bsd"}> : () -> ()
    %cst_104 = arith.constant dense<0.000000e+00> : vector<2x8x8xf32>
    %277 = tpu.matmul %276, %265, %cst_104 {dimension_numbers = #tpu.dot_dimension_numbers<[2], [1], [1], [2], [0, 0, 0, 1, 1, 2], [0], [0]>} : vector<2x8x8xf32>, vector<2x8x8xf32>, vector<2x8x8xf32> -> vector<2x8x8xf32>
    "tpu.trace_stop"() : () -> ()
    %278 = vector.shape_cast %277 : vector<2x8x8xf32> to vector<16x8xf32>
    %279 = vector.extract_strided_slice %194 {offsets = [24, 0], sizes = [8, 32], strides = [1, 1]} : vector<32x32xf32> to vector<8x32xf32>
    %cst_105 = arith.constant dense<0.000000e+00> : vector<16x32xf32>
    %280 = tpu.matmul %278, %279, %cst_105 {dimension_numbers = #tpu.dot_dimension_numbers<[1], [0], [0], [1], [0, 0, 1, 1], [], []>} : vector<16x8xf32>, vector<8x32xf32>, vector<16x32xf32> -> vector<16x32xf32>
    %281 = arith.addf %259, %280 : vector<16x32xf32>
    %c1_106 = arith.constant 1 : index
    %c0_107 = arith.constant 0 : index
    %c0_108 = arith.constant 0 : index
    %282 = vector.load %arg6[%c1_106, %c0_107, %c0_108] : memref<2x1x32xf32, #tpu.memory_space<vmem>>, vector<1x1x32xf32>
    %283 = vector.shape_cast %282 : vector<1x1x32xf32> to vector<1x32xf32>
    %284 = vector.broadcast %283 : vector<1x32xf32> to vector<16x32xf32>
    %285 = arith.addf %281, %284 : vector<16x32xf32>
    %286 = arith.addf %180, %285 : vector<16x32xf32>
    %c1_109 = arith.constant 1 : index
    %c0_110 = arith.constant 0 : index
    %c0_111 = arith.constant 0 : index
    %287 = vector.load %arg7[%c1_109, %c0_110, %c0_111] : memref<2x1x32xf32, #tpu.memory_space<vmem>>, vector<1x1x32xf32>
    %288 = vector.shape_cast %287 : vector<1x1x32xf32> to vector<1x32xf32>
    %c1_112 = arith.constant 1 : index
    %c0_113 = arith.constant 0 : index
    %c0_114 = arith.constant 0 : index
    %289 = vector.load %arg8[%c1_112, %c0_113, %c0_114] : memref<2x1x32xf32, #tpu.memory_space<vmem>>, vector<1x1x32xf32>
    %290 = vector.shape_cast %289 : vector<1x1x32xf32> to vector<1x32xf32>
    %cst_115 = arith.constant dense<0.000000e+00> : vector<16xf32>
    %291 = vector.multi_reduction <add>, %286, %cst_115 [1] : vector<16x32xf32> to vector<16xf32>
    %292 = vector.shape_cast %291 : vector<16xf32> to vector<16x1xf32>
    %cst_116 = arith.constant 3.200000e+01 : f32
    %293 = vector.broadcast %cst_116 : f32 to vector<16x1xf32>
    %294 = arith.divf %292, %293 : vector<16x1xf32>
    %295 = vector.broadcast %294 : vector<16x1xf32> to vector<16x32xf32>
    %296 = arith.subf %286, %295 : vector<16x32xf32>
    %297 = arith.mulf %296, %296 : vector<16x32xf32>
    %cst_117 = arith.constant dense<0.000000e+00> : vector<16xf32>
    %298 = vector.multi_reduction <add>, %297, %cst_117 [1] : vector<16x32xf32> to vector<16xf32>
    %299 = vector.shape_cast %298 : vector<16xf32> to vector<16x1xf32>
    %cst_118 = arith.constant 3.200000e+01 : f32
    %300 = vector.broadcast %cst_118 : f32 to vector<16x1xf32>
    %301 = arith.divf %299, %300 : vector<16x1xf32>
    %cst_119 = arith.constant 9.99999974E-6 : f32
    %302 = vector.broadcast %cst_119 : f32 to vector<16x1xf32>
    %303 = arith.addf %301, %302 : vector<16x1xf32>
    %304 = math.rsqrt %303 : vector<16x1xf32>
    %305 = vector.broadcast %304 : vector<16x1xf32> to vector<16x32xf32>
    %306 = arith.mulf %296, %305 : vector<16x32xf32>
    %307 = vector.broadcast %288 : vector<1x32xf32> to vector<16x32xf32>
    %308 = arith.mulf %306, %307 : vector<16x32xf32>
    %309 = vector.broadcast %290 : vector<1x32xf32> to vector<16x32xf32>
    %310 = arith.addf %308, %309 : vector<16x32xf32>
    %c1_120 = arith.constant 1 : index
    %c0_121 = arith.constant 0 : index
    %c0_122 = arith.constant 0 : index
    %311 = vector.load %arg9[%c1_120, %c0_121, %c0_122] : memref<2x32x64xf32, #tpu.memory_space<vmem>>, vector<1x32x64xf32>
    %312 = vector.shape_cast %311 : vector<1x32x64xf32> to vector<32x64xf32>
    %cst_123 = arith.constant dense<0.000000e+00> : vector<16x64xf32>
    %313 = tpu.matmul %310, %312, %cst_123 {dimension_numbers = #tpu.dot_dimension_numbers<[1], [0], [0], [1], [0, 0, 1, 1], [], []>} : vector<16x32xf32>, vector<32x64xf32>, vector<16x64xf32> -> vector<16x64xf32>
    %c1_124 = arith.constant 1 : index
    %c0_125 = arith.constant 0 : index
    %c0_126 = arith.constant 0 : index
    %314 = vector.load %arg10[%c1_124, %c0_125, %c0_126] : memref<2x1x64xf32, #tpu.memory_space<vmem>>, vector<1x1x64xf32>
    %315 = vector.shape_cast %314 : vector<1x1x64xf32> to vector<1x64xf32>
    %316 = vector.broadcast %315 : vector<1x64xf32> to vector<16x64xf32>
    %317 = arith.addf %313, %316 : vector<16x64xf32>
    %cst_127 = arith.constant 0.000000e+00 : f32
    %318 = vector.broadcast %cst_127 : f32 to vector<16x64xf32>
    %319 = arith.maximumf %317, %318 : vector<16x64xf32>
    %c1_128 = arith.constant 1 : index
    %c0_129 = arith.constant 0 : index
    %c0_130 = arith.constant 0 : index
    %320 = vector.load %arg11[%c1_128, %c0_129, %c0_130] : memref<2x64x32xf32, #tpu.memory_space<vmem>>, vector<1x64x32xf32>
    %321 = vector.shape_cast %320 : vector<1x64x32xf32> to vector<64x32xf32>
    %cst_131 = arith.constant dense<0.000000e+00> : vector<16x32xf32>
    %322 = tpu.matmul %319, %321, %cst_131 {dimension_numbers = #tpu.dot_dimension_numbers<[1], [0], [0], [1], [0, 0, 1, 1], [], []>} : vector<16x64xf32>, vector<64x32xf32>, vector<16x32xf32> -> vector<16x32xf32>
    %c1_132 = arith.constant 1 : index
    %c0_133 = arith.constant 0 : index
    %c0_134 = arith.constant 0 : index
    %323 = vector.load %arg12[%c1_132, %c0_133, %c0_134] : memref<2x1x32xf32, #tpu.memory_space<vmem>>, vector<1x1x32xf32>
    %324 = vector.shape_cast %323 : vector<1x1x32xf32> to vector<1x32xf32>
    %325 = vector.broadcast %324 : vector<1x32xf32> to vector<16x32xf32>
    %326 = arith.addf %322, %325 : vector<16x32xf32>
    %327 = arith.addf %310, %326 : vector<16x32xf32>
    %c1_135 = arith.constant 1 : index
    %c0_136 = arith.constant 0 : index
    %c0_137 = arith.constant 0 : index
    %328 = vector.load %arg13[%c1_135, %c0_136, %c0_137] : memref<2x1x32xf32, #tpu.memory_space<vmem>>, vector<1x1x32xf32>
    %329 = vector.shape_cast %328 : vector<1x1x32xf32> to vector<1x32xf32>
    %c1_138 = arith.constant 1 : index
    %c0_139 = arith.constant 0 : index
    %c0_140 = arith.constant 0 : index
    %330 = vector.load %arg14[%c1_138, %c0_139, %c0_140] : memref<2x1x32xf32, #tpu.memory_space<vmem>>, vector<1x1x32xf32>
    %331 = vector.shape_cast %330 : vector<1x1x32xf32> to vector<1x32xf32>
    %cst_141 = arith.constant dense<0.000000e+00> : vector<16xf32>
    %332 = vector.multi_reduction <add>, %327, %cst_141 [1] : vector<16x32xf32> to vector<16xf32>
    %333 = vector.shape_cast %332 : vector<16xf32> to vector<16x1xf32>
    %cst_142 = arith.constant 3.200000e+01 : f32
    %334 = vector.broadcast %cst_142 : f32 to vector<16x1xf32>
    %335 = arith.divf %333, %334 : vector<16x1xf32>
    %336 = vector.broadcast %335 : vector<16x1xf32> to vector<16x32xf32>
    %337 = arith.subf %327, %336 : vector<16x32xf32>
    %338 = arith.mulf %337, %337 : vector<16x32xf32>
    %cst_143 = arith.constant dense<0.000000e+00> : vector<16xf32>
    %339 = vector.multi_reduction <add>, %338, %cst_143 [1] : vector<16x32xf32> to vector<16xf32>
    %340 = vector.shape_cast %339 : vector<16xf32> to vector<16x1xf32>
    %cst_144 = arith.constant 3.200000e+01 : f32
    %341 = vector.broadcast %cst_144 : f32 to vector<16x1xf32>
    %342 = arith.divf %340, %341 : vector<16x1xf32>
    %cst_145 = arith.constant 9.99999974E-6 : f32
    %343 = vector.broadcast %cst_145 : f32 to vector<16x1xf32>
    %344 = arith.addf %342, %343 : vector<16x1xf32>
    %345 = math.rsqrt %344 : vector<16x1xf32>
    %346 = vector.broadcast %345 : vector<16x1xf32> to vector<16x32xf32>
    %347 = arith.mulf %337, %346 : vector<16x32xf32>
    %348 = vector.broadcast %329 : vector<1x32xf32> to vector<16x32xf32>
    %349 = arith.mulf %347, %348 : vector<16x32xf32>
    %350 = vector.broadcast %331 : vector<1x32xf32> to vector<16x32xf32>
    %351 = arith.addf %349, %350 : vector<16x32xf32>
    %c0_146 = arith.constant 0 : index
    %c0_147 = arith.constant 0 : index
    %352 = vector.load %arg15[%c0_146, %c0_147] : memref<32x128xf32, #tpu.memory_space<vmem>>, vector<32x128xf32>
    %cst_148 = arith.constant dense<0.000000e+00> : vector<16x128xf32>
    %353 = tpu.matmul %351, %352, %cst_148 {dimension_numbers = #tpu.dot_dimension_numbers<[1], [0], [0], [1], [0, 0, 1, 1], [], []>} : vector<16x32xf32>, vector<32x128xf32>, vector<16x128xf32> -> vector<16x128xf32>
    %c0_149 = arith.constant 0 : index
    %c0_150 = arith.constant 0 : index
    %354 = vector.load %arg16[%c0_149, %c0_150] : memref<1x128xf32, #tpu.memory_space<vmem>>, vector<1x128xf32>
    %355 = vector.broadcast %354 : vector<1x128xf32> to vector<16x128xf32>
    %356 = arith.addf %353, %355 : vector<16x128xf32>
    %c0_151 = arith.constant 0 : index
    %c0_152 = arith.constant 0 : index
    %357 = vector.load %arg17[%c0_151, %c0_152] : memref<16x128xf32, #tpu.memory_space<vmem>>, vector<16x128xf32>
    tpu.vector_store %arg17[%c0_151, %c0_152], %356 {strides = array<i32>} : memref<16x128xf32, #tpu.memory_space<vmem>>, vector<16x128xf32>,
    return
  }
}

</mosaic_0001>

<bundles_post_ra>
// kernel: forward.1
= control target key start
LH: loop header
LB: loop body
LE: loop exit
PB: predicated region body
PF: predicated region fallthrough
CT: control target
= control target key end

     0   :  { %v5133_v0 = vmov 0   ;;  %v5134_v18 = vmov 0.0   ;;  %v58_v19 = vlaneseq  ;;  %vm82_vm0 = vcmask 523264   ;;  %s5137_s30 = smov 64   ;;  %s5138_s18 = smov 88   ;;  %s5828_s0 = inlined_call_operand.vmem [shape: s32[16,1], index: 0, kind: input, shape index: {}]   ;;  %s5829_s1 = inlined_call_operand.vmem [shape: f32[64,32], index: 1, kind: input, shape index: {}]   ;;  %s5830_s3 = inlined_call_operand.vmem [shape: f32[2,32,96], index: 3, kind: input, shape index: {}]   ;;  %s5831_s2 = inlined_call_operand.vmem [shape: f32[16,32], index: 2, kind: input, shape index: {}]   ;;  %s5832_s4 = inlined_call_operand.vmem [shape: f32[2,1,96], index: 4, kind: input, shape index: {}]   ;;  %s5833_s5 = inlined_call_operand.vmem [shape: f32[2,32,32], index: 5, kind: input, shape index: {}]   ;;  %s5834_s6 = inlined_call_operand.vmem [shape: f32[2,1,32], index: 6, kind: input, shape index: {}]   ;;  %s5835_s9 = inlined_call_operand.vmem [shape: f32[2,32,64], index: 9, kind: input, shape index: {}]   ;;  %s5836_s11 = inlined_call_operand.vmem [shape: f32[2,64,32], index: 11, kind: input, shape index: {}]   ;;  %s5837_s7 = inlined_call_operand.vmem [shape: f32[2,1,32], index: 7, kind: input, shape index: {}]   ;;  %s5838_s8 = inlined_call_operand.vmem [shape: f32[2,1,32], index: 8, kind: input, shape index: {}]   ;;  %s5839_s10 = inlined_call_operand.vmem [shape: f32[2,1,64], index: 10, kind: input, shape index: {}]   ;;  %s5840_s12 = inlined_call_operand.vmem [shape: f32[2,1,32], index: 12, kind: input, shape index: {}]   ;;  %s5841_s13 = inlined_call_operand.vmem [shape: f32[2,1,32], index: 13, kind: input, shape index: {}]   ;;  %s5842_s14 = inlined_call_operand.vmem [shape: f32[2,1,32], index: 14, kind: input, shape index: {}]   ;;  %s5843_s15 = inlined_call_operand.vmem [shape: f32[32,128], index: 15, kind: input, shape index: {}]   ;;  %s5844_s16 = inlined_call_operand.vmem [shape: f32[1,128], index: 16, kind: input, shape index: {}]   ;;  %s5845_s17 = inlined_call_operand.vmem [shape: f32[16,128], index: 17, kind: output, shape index: {}]  }
   0x1   :  { %5858 = sst [smem:[#allocation2_spill]] %s5828_s0  ;;  %5052 = vset.pattern.permute.xlu0 %v5133_v0  ;;  %v164_v14 = vld [vmem:[%s5830_s3] sm:$0xff]  ;;  %v165_v15 = vld [vmem:[%s5830_s3 + $0x8] sm:$0xff]  ;;  %v166_v25 = vld [vmem:[%s5830_s3 + $0x10] sm:$0xff]  ;;  %vm175_vm3 = vcmask 261120   ;;  %vm5135_vm4 = vmmov 0  }
   0x2   :  { %5859 = sst [smem:[#allocation3_spill]] %s5829_s1  ;;  %s5860_s26 = sld [smem:[#allocation2_spill]]  ;;  %v4954_v16 = vpack.c.bf16 %v165_v15, %v164_v14  ;;  %v59_v20 = vand.u32 127, %v58_v19  ;;  %v167_v26 = vld [vmem:[%s5830_s3 + $0x18] sm:$0xff]  ;;  %v80_v28 = vld [vmem:[%s5831_s2] sm:$0xff]  ;;  %v81_v29 = vld [vmem:[%s5831_s2 + $0x8] sm:$0xff] }
   0x3   :  { %s5861_s29 = sld [smem:[#allocation3_spill]]  ;;  %v4958_v27 = vpack.c.bf16 %v167_v26, %v166_v25  ;;  %v4355_v34 = vld [vmem:[%s5832_s4] ss:$0 sm:$0xff]  ;;  %vm266_vm5 = vcmask 64512   ;;  %s5139_s19 = smov 120  }
   0x4   :  { %4955 = vmatprep.subr.bf16.mxu1 %v4954_v16  ;;  %s5140_s1 = smov 80   ;;  %s5141_s20 = smov 56  }
   0x5   :  { %4957 = vmatpush3.bf16.msra.mxu1 %v4954_v16  ;;  %s5854_s21 = smov 48   ;;  %s5852_s22 = smov 72  }
   0x6   :  { %4959 = vmatprep.subr.bf16.mxu1 %v4958_v27  ;;  %s5850_s23 = smov 104   ;;  %s5848_s24 = smov 40  }
   0x7   :  { %s5866_s0 = smov 40  }
   0x8   :  { %v56_v1 = vld [vmem:[%s5860_s26] sm:$0xff]  ;;  %v57_v6 = vld [vmem:[%s5860_s26 + $0x8] sm:$0xff]  ;;  %s5136_s26 = smov 96  }
   0x9   :  { %v72_v2 = vld [vmem:[%s5861_s29] sm:$0xff]  ;;  %61 = vperm.xlu0 %5052, %v56_v1   ;;  %v73_v3 = vld [vmem:[%s5861_s29 + $0x8] sm:$0xff]  ;;  %v74_v4 = vld [vmem:[%s5861_s29 + $0x10] sm:$0xff]  ;;  %4961 = vmatpush3.bf16.msra.mxu1 %v4958_v27 }
   0xa   :  { %v75_v5 = vld [vmem:[%s5861_s29 + $0x18] sm:$0xff]  ;;  %v4938_v7 = vpack.c.bf16 %v73_v3, %v72_v2  ;;  %v76_v9 = vld [vmem:[%s5861_s29 + $0x20] sm:$0xff]  ;;  %v77_v10 = vld [vmem:[%s5861_s29 + $0x28] sm:$0xff]  ;;  %4656 = vmatprep.subr.mxu1 %v5134_v18 }
   0xb   :  { %v4942_v8 = vpack.c.bf16 %v75_v5, %v74_v4  ;;  %v4946_v11 = vpack.c.bf16 %v77_v10, %v76_v9  ;;  %v78_v12 = vld [vmem:[%s5861_s29 + $0x30] sm:$0xff]  ;;  %v79_v13 = vld [vmem:[%s5861_s29 + $0x38] sm:$0xff]  ;;  %s5856_s29 = smov 112  }
   0xc   :  { %4939 = vmatprep.subr.bf16.mxu0 %v4938_v7  ;;  %v4950_v17 = vpack.c.bf16 %v79_v13, %v78_v12 }
   0xd   :  { %64 = vperm.xlu0 %5052, %v57_v6   ;;  %4941 = vmatpush3.bf16.msra.mxu0 %v4938_v7 }
   0xe   :  { %4943 = vmatprep.subr.bf16.mxu0 %v4942_v8 }
  0x11   :  { %4945 = vmatpush3.bf16.msra.mxu0 %v4942_v8 }
  0x12   :  { %4947 = vmatprep.subr.bf16.mxu0 %v4946_v11 }
  0x15   :  { %4949 = vmatpush3.bf16.msra.mxu0 %v4946_v11 }
  0x16   :  { %4951 = vmatprep.subr.bf16.mxu0 %v4950_v17 }
  0x19   :  { %4953 = vmatpush3.bf16.msra.mxu0 %v4950_v17 }
  0x1a   :  { %4676 = vmatprep.subr.mxu0 %v5134_v18 }
  0x88   :  { %v62_v21 = vpop.permute.xlu0 %61 }
  0x89   :  { %vm66_vm1 = vcmp.eq.s32.totalorder %v62_v21, %v59_v20 }
  0x8a   :  { %v4351_v22 = vsel %vm66_vm1, 1.0, %v5134_v18 }
  0x8b   :  { %4642 = vmatprep.mubr.msk.f32.mxu0 %vm82_vm0, %v4351_v22 }
  0x8c   :  { %v65_v23 = vpop.permute.xlu0 %64 }
  0x8d   :  { %vm67_vm2 = vcmp.eq.s32.totalorder %v65_v23, %v59_v20 }
  0x8e   :  { %v4352_v24 = vsel %vm67_vm2, 1.0, %v5134_v18 }
  0x8f   :  { %4643 = vmatmul.mubr.msk.f32.vlgmr.msra.gmra.mrb[0].mxu0 %vm82_vm0, %v4352_v24 }
  0x90   :  { %4678 = vmatprep.mubr.msk.f32.mxu0 %vm5135_vm4, %v5134_v18 }
 0x162   :  { %v4644_v30 = vpop.f32.mrb[0].mxu0 }
 0x163   :  { %v155_v31 = vpop.f32.mrb[1].mxu0  ;;  %v5293_v33 = vadd.f32 %v4644_v30, %v81_v29 }
 0x164   :  { %v5291_v32 = vadd.f32 %v155_v31, %v80_v28 }
 0x166   :  { %4653 = vmatprep.mubr.msk.f32.mxu1 %vm175_vm3, %v5291_v32 }
 0x167   :  { %4654 = vmatmul.mubr.msk.f32.vlgmr.msra.gmra.mrb[0].mxu1 %vm175_vm3, %v5293_v33 }
 0x168   :  { %4658 = vmatprep.mubr.msk.f32.mxu1 %vm5135_vm4, %v5134_v18 }
 0x23a   :  { %v4655_v35 = vpop.f32.mrb[0].mxu1 }
 0x23b   :  { %v248_v36 = vpop.f32.mrb[1].mxu1  ;;  %v5310_v38 = vadd.f32 %v4655_v35, %v4355_v34 }
 0x23c   :  { %v5306_v37 = vadd.f32 %v4355_v34, %v248_v36 }
 0x23d   :  { %v5325_v42 = vmul.f32 0.35355338, %v5310_v38 }
 0x23e   :  { %264 = vrot.lane.b32.xlu1 %v5306_v37, %s5136_s26  ;;  %v5317_v40 = vmul.f32 0.35355338, %v5306_v37 }
 0x242   :  { %343 = vrot.lane.b32.xlu1 %v5310_v38, %s5136_s26 }
 0x2b0   :  { %v265_v39 = vpop.permute.xlu1 %264 }
 0x2b1   :  { %4657 = vmatpush3.xpose.msk.msra.mxu1 %vm266_vm5, %v265_v39 }
 0x2b2   :  { %4661 = vmatprep.subr.mxu1 %v5134_v18 }
 0x2b4   :  { %v344_v41 = vpop.permute.xlu1 %343  ;;  %4659 = vmatmul.mubr.msk.f32.vlgmr.msra.gmra.mrb[2].mxu1 %vm266_vm5, %v5317_v40 }
 0x2b5   :  { %4662 = vmatpush3.xpose.msk.msra.mxu1 %vm266_vm5, %v344_v41  ;;  %4663 = vmatprep.mubr.msk.f32.mxu1 %vm5135_vm4, %v5134_v18 }
 0x2b6   :  { %4666 = vmatprep.subr.mxu1 %v5134_v18 }
 0x2b8   :  { %4664 = vmatmul.mubr.msk.f32.vlgmr.msra.gmra.mrb[4].mxu1 %vm266_vm5, %v5325_v42 }
 0x2b9   :  { %4668 = vmatprep.mubr.msk.f32.mxu1 %vm5135_vm4, %v5134_v18 }
 0x387   :  { %v338_v43 = vpop.f32.mrb[2].mxu1 }
 0x388   :  { %v4660_v44 = vpop.f32.mrb[3].mxu1  ;;  %v420_v45 = vsel %vm266_vm5, %v338_v43, -inf }
 0x389   :  { %421 = vmax.xlane.f32.xlu0 %v420_v45 }
 0x38b   :  { %v416_v46 = vpop.f32.mrb[4].mxu1 }
 0x38c   :  { %v4665_v47 = vpop.f32.mrb[5].mxu1  ;;  %v423_v48 = vsel %vm266_vm5, %v416_v46, -inf }
 0x38d   :  { %424 = vmax.xlane.f32.xlu1 %v423_v48 }
 0x39e   :  { %442 = vrot.lane.b32.xlu1 %v5306_v37, %s5137_s30 }
 0x3a2   :  { %674 = vrot.lane.b32.xlu1 %v5310_v38, %s5138_s18 }
 0x3a6   :  { %672 = vrot.lane.b32.xlu1 %v5325_v42, %s5139_s19 }
 0x3aa   :  { %594 = vrot.lane.b32.xlu1 %v5317_v40, %s5139_s19 }
 0x3ae   :  { %1088 = vrot.lane.b32.xlu1 %v5306_v37, %s5140_s1 }
 0x416   :  { %v422_v49 = vpop.xlane.xlu0 %421 }
 0x417   :  { %v426_v50 = vsub.f32 %v338_v43, %v422_v49 }
 0x419   :  { %v428_v51 = vmul.f32 1.442695, %v426_v50 }
 0x41a   :  { %v425_v52 = vpop.xlane.xlu1 %424 }
 0x41b   :  { %5053 = vpow2.f32 %v428_v51  ;;  %v427_v53 = vsub.f32 %v416_v46, %v425_v52 }
 0x41d   :  { %v430_v54 = vmul.f32 1.442695, %v427_v53 }
 0x41e   :  { %v443_v55 = vpop.permute.xlu1 %442 }
 0x41f   :  { %5055 = vpow2.f32 %v430_v54  ;;  %4667 = vmatpush3.msra.mxu1 %v443_v55  ;;  %v260_v54 = vld [vmem:[%s5833_s5 + $0x8] sm:$0xff]  ;;  %v259_v55 = vld [vmem:[%s5833_s5] sm:$0xff] }
 0x420   :  { %4671 = vmatprep.subr.mxu1 %v5134_v18 }
 0x422   :  { %v675_v61 = vpop.permute.xlu1 %674 }
 0x425   :  { %v5054_v56 = vpop.eup %5053 }
 0x426   :  { %v432_v57 = vsel %vm266_vm5, %v5054_v56, 0.0  ;;  %v673_v0 = vpop.permute.xlu1 %672 }
 0x427   :  { %433 = vadd.xlane.f32.xlu0 %v432_v57 }
 0x429   :  { %v5056_v58 = vpop.eup %5055 }
 0x42a   :  { %v435_v59 = vsel %vm266_vm5, %v5056_v58, 0.0  ;;  %v595_v5 = vpop.permute.xlu1 %594 }
 0x42b   :  { %436 = vadd.xlane.f32.xlu0 %v435_v59 }
 0x42e   :  { %v1089_v24 = vpop.permute.xlu1 %1088 }
 0x441   :  { %518 = vrot.lane.b32.xlu0 %v5310_v38, %s5137_s30 }
 0x445   :  { %596 = vrot.lane.b32.xlu0 %v5306_v37, %s5138_s18 }
 0x4b4   :  { %v434_v60 = vpop.xlane.xlu0 %433 }
 0x4b5   :  { %5057 = vrcp.f32 %v434_v60 }
 0x4b8   :  { %v437_v62 = vpop.xlane.xlu0 %436 }
 0x4b9   :  { %5059 = vrcp.f32 %v437_v62 }
 0x4bc   :  { %v519_v63 = vpop.permute.xlu0 %518 }
 0x4bf   :  { %v5058_v1 = vpop.eup %5057 }
 0x4c0   :  { %v440_v2 = vmul.f32 %v5058_v1, %v5054_v56  ;;  %v597_v3 = vpop.permute.xlu0 %596 }
 0x4c1   :  { %4677 = vmatpush3.xpose.msk.msra.mxu0 %vm266_vm5, %v597_v3 }
 0x4c2   :  { %4669 = vmatmul.mubr.msk.f32.vlgmr.msra.gmra.mrb[6].mxu1 %vm266_vm5, %v440_v2  ;;  %4686 = vmatprep.subr.mxu0 %v5134_v18 }
 0x4c3   :  { %v5060_v4 = vpop.eup %5059  ;;  %4672 = vmatpush3.msra.mxu1 %v519_v63  ;;  %4673 = vmatprep.mubr.msk.f32.mxu1 %vm5135_vm4, %v5134_v18 }
 0x4c4   :  { %v441_v6 = vmul.f32 %v5060_v4, %v5056_v58  ;;  %4679 = vmatmul.mubr.msk.f32.vlgmr.msra.gmra.mrb[2].mxu0 %vm266_vm5, %v595_v5  ;;  %4681 = vmatprep.subr.mxu1 %v5134_v18  ;;  %v261_v5 = vld [vmem:[%s5833_s5 + $0x10] sm:$0xff] }
 0x4c5   :  { %4688 = vmatprep.mubr.msk.f32.mxu0 %vm5135_vm4, %v5134_v18 }
 0x4c6   :  { %4674 = vmatmul.mubr.msk.f32.vlgmr.msra.gmra.mrb[8].mxu1 %vm266_vm5, %v441_v6 }
 0x4c7   :  { %4683 = vmatprep.mubr.msk.f32.mxu1 %vm5135_vm4, %v5134_v18 }
 0x4ca   :  { %4682 = vmatpush3.xpose.msk.msra.mxu1 %vm266_vm5, %v675_v61 }
 0x4cb   :  { %4691 = vmatprep.subr.mxu1 %v5134_v18 }
 0x4cd   :  { %4684 = vmatmul.mubr.msk.f32.vlgmr.msra.gmra.mrb[10].mxu1 %vm266_vm5, %v673_v0 }
 0x4ce   :  { %4693 = vmatprep.mubr.msk.f32.mxu1 %vm5135_vm4, %v5134_v18 }
 0x595   :  { %v5368_v7 = vpop.f32.mrb[6].mxu1 }
 0x596   :  { %v4670_v8 = vpop.f32.mrb[7].mxu1 }
 0x597   :  { %v668_v9 = vpop.f32.mrb[2].mxu0 }
 0x598   :  { %v4680_v10 = vpop.f32.mrb[3].mxu0  ;;  %v750_v23 = vsel %vm266_vm5, %v668_v9, -inf }
 0x599   :  { %v5370_v11 = vpop.f32.mrb[8].mxu1 }
 0x59a   :  { %v4675_v12 = vpop.f32.mrb[9].mxu1 }
 0x5a0   :  { %v746_v13 = vpop.f32.mrb[10].mxu1 }
 0x5a1   :  { %v4685_v14 = vpop.f32.mrb[11].mxu1  ;;  %v753_v15 = vsel %vm266_vm5, %v746_v13, -inf }
 0x5a2   :  { %754 = vmax.xlane.f32.xlu0 %v753_v15 }
 0x5b8   :  { %848 = vrot.lane.b32.xlu0 %v5310_v38, %s5141_s20 }
 0x5bc   :  { %1086 = vrot.lane.b32.xlu0 %v5317_v40, %s5856_s29 }
 0x5c0   :  { %1164 = vrot.lane.b32.xlu0 %v5325_v42, %s5856_s29 }
 0x62f   :  { %v755_v16 = vpop.xlane.xlu0 %754 }
 0x630   :  { %v757_v17 = vsub.f32 %v746_v13, %v755_v16 }
 0x632   :  { %v760_v19 = vmul.f32 1.442695, %v757_v17 }
 0x633   :  { %v849_v20 = vpop.permute.xlu0 %848 }
 0x634   :  { %5061 = vpow2.f32 %v760_v19  ;;  %4692 = vmatpush3.msra.mxu1 %v849_v20 }
 0x635   :  { %4706 = vmatprep.subr.mxu1 %v5134_v18 }
 0x637   :  { %v1087_v28 = vpop.permute.xlu0 %1086 }
 0x63b   :  { %v1165_v30 = vpop.permute.xlu0 %1164 }
 0x63e   :  { %v5062_v21 = vpop.eup %5061 }
 0x63f   :  { %v765_v22 = vsel %vm266_vm5, %v5062_v21, 0.0 }
 0x640   :  { %766 = vadd.xlane.f32.xlu1 %v765_v22 }
 0x651   :  { %1166 = vrot.lane.b32.xlu1 %v5310_v38, %s5140_s1 }
 0x675   :  { %751 = vmax.xlane.f32.xlu1 %v750_v23 }
 0x6cd   :  { %v767_v25 = vpop.xlane.xlu1 %766 }
 0x6ce   :  { %5063 = vrcp.f32 %v767_v25 }
 0x6d1   :  { %v1167_v29 = vpop.permute.xlu1 %1166 }
 0x6d8   :  { %v5064_v26 = vpop.eup %5063 }
 0x6d9   :  { %v771_v27 = vmul.f32 %v5064_v26, %v5062_v21 }
 0x6db   :  { %4694 = vmatmul.mubr.msk.f32.vlgmr.msra.gmra.mrb[12].mxu1 %vm266_vm5, %v771_v27 }
 0x6dc   :  { %4707 = vmatpush3.xpose.msk.msra.mxu1 %vm266_vm5, %v1089_v24  ;;  %4708 = vmatprep.mubr.msk.f32.mxu1 %vm5135_vm4, %v5134_v18 }
 0x6dd   :  { %4711 = vmatprep.subr.mxu1 %v5134_v18 }
 0x6df   :  { %4709 = vmatmul.mubr.msk.f32.vlgmr.msra.gmra.mrb[14].mxu1 %vm266_vm5, %v1087_v28 }
 0x6e0   :  { %4712 = vmatpush3.xpose.msk.msra.mxu1 %vm266_vm5, %v1167_v29  ;;  %4713 = vmatprep.mubr.msk.f32.mxu1 %vm5135_vm4, %v5134_v18 }
 0x6e1   :  { %4721 = vmatprep.subr.mxu1 %v5134_v18 }
 0x6e3   :  { %4714 = vmatmul.mubr.msk.f32.vlgmr.msra.gmra.mrb[16].mxu1 %vm266_vm5, %v1165_v30 }
 0x6e4   :  { %4723 = vmatprep.mubr.msk.f32.mxu1 %vm5135_vm4, %v5134_v18 }
 0x702   :  { %v752_v31 = vpop.xlane.xlu1 %751 }
 0x703   :  { %v756_v34 = vsub.f32 %v668_v9, %v752_v31 }
 0x705   :  { %v758_v35 = vmul.f32 1.442695, %v756_v34 }
 0x707   :  { %5065 = vpow2.f32 %v758_v35 }
 0x711   :  { %v5066_v36 = vpop.eup %5065 }
 0x712   :  { %v762_v39 = vsel %vm266_vm5, %v5066_v36, 0.0 }
 0x713   :  { %763 = vadd.xlane.f32.xlu0 %v762_v39 }
 0x729   :  { %772 = vrot.lane.b32.xlu0 %v5306_v37, %s5141_s20 }
 0x72d   :  { %1340 = vrot.lane.b32.xlu0 %v5310_v38, %s5854_s21 }
 0x731   :  { %1501 = vrot.lane.b32.xlu0 %v5306_v37, %s5852_s22 }
 0x735   :  { %1579 = vrot.lane.b32.xlu0 %v5310_v38, %s5852_s22 }
 0x739   :  { %1499 = vrot.lane.b32.xlu0 %v5317_v40, %s5850_s23 }
 0x7a0   :  { %v764_v41 = vpop.xlane.xlu0 %763 }
 0x7a1   :  { %5067 = vrcp.f32 %v764_v41 }
 0x7a4   :  { %v773_v43 = vpop.permute.xlu0 %772 }
 0x7a5   :  { %4687 = vmatpush3.msra.mxu0 %v773_v43 }
 0x7a6   :  { %4696 = vmatprep.subr.mxu0 %v260_v54 }
 0x7a8   :  { %v1341_v44 = vpop.permute.xlu0 %1340 }
 0x7a9   :  { %4722 = vmatpush3.msra.mxu1 %v1341_v44 }
 0x7aa   :  { %4731 = vmatprep.subr.mxu1 %v5134_v18 }
 0x7ab   :  { %v5068_v45 = vpop.eup %5067 }
 0x7ac   :  { %v770_v46 = vmul.f32 %v5068_v45, %v5066_v36  ;;  %v1502_v8 = vpop.permute.xlu0 %1501 }
 0x7ae   :  { %4689 = vmatmul.mubr.msk.f32.vlgmr.msra.gmra.mrb[4].mxu0 %vm266_vm5, %v770_v46  ;;  %v920_v47 = vpop.f32.mrb[12].mxu1  ;;  %v262_v46 = vld [vmem:[%s5833_s5 + $0x18] sm:$0xff] }
 0x7af   :  { %v4695_v48 = vpop.f32.mrb[13].mxu1  ;;  %4697 = vmatpush3.msra.mxu0 %v260_v54 }
 0x7b0   :  { %4701 = vmatprep.subr.mxu0 %v259_v55 }
 0x7b2   :  { %v1160_v49 = vpop.f32.mrb[14].mxu1 }
 0x7b3   :  { %v4710_v50 = vpop.f32.mrb[15].mxu1  ;;  %v1242_v51 = vsel %vm266_vm5, %v1160_v49, -inf }
 0x7b4   :  { %1243 = vmax.xlane.f32.xlu1 %v1242_v51 }
 0x7b6   :  { %v1238_v40 = vpop.f32.mrb[16].mxu1 }
 0x7b7   :  { %v4715_v52 = vpop.f32.mrb[17].mxu1  ;;  %v1245_v53 = vsel %vm266_vm5, %v1238_v40, -inf }
 0x7b8   :  { %1246 = vmax.xlane.f32.xlu1 %v1245_v53  ;;  %v4390_v52 = vld [vmem:[%s5834_s6] ss:$0 sm:$0xff] }
 0x841   :  { %v1244_v56 = vpop.xlane.xlu1 %1243 }
 0x842   :  { %v1248_v57 = vsub.f32 %v1160_v49, %v1244_v56 }
 0x844   :  { %v1250_v58 = vmul.f32 1.442695, %v1248_v57 }
 0x845   :  { %v1247_v59 = vpop.xlane.xlu1 %1246 }
 0x846   :  { %5069 = vpow2.f32 %v1250_v58  ;;  %v1249_v60 = vsub.f32 %v1238_v40, %v1247_v59 }
 0x848   :  { %v1252_v61 = vmul.f32 1.442695, %v1249_v60 }
 0x84a   :  { %5071 = vpow2.f32 %v1252_v61 }
 0x850   :  { %v5070_v62 = vpop.eup %5069 }
 0x851   :  { %v1254_v63 = vsel %vm266_vm5, %v5070_v62, 0.0 }
 0x852   :  { %1255 = vadd.xlane.f32.xlu1 %v1254_v63 }
 0x854   :  { %v5072_v0 = vpop.eup %5071 }
 0x855   :  { %v1257_v1 = vsel %vm266_vm5, %v5072_v0, 0.0 }
 0x856   :  { %1258 = vadd.xlane.f32.xlu1 %v1257_v1 }
 0x867   :  { %1264 = vrot.lane.b32.xlu1 %v5306_v37, %s5854_s21 }
 0x86b   :  { %1577 = vrot.lane.b32.xlu1 %v5325_v42, %s5850_s23 }
 0x881   :  { %v844_v2 = vpop.f32.mrb[4].mxu0 }
 0x882   :  { %v4690_v3 = vpop.f32.mrb[5].mxu0  ;;  %4698 = vmatprep.mubr.msk.f32.mxu0 %vm266_vm5, %v844_v2 }
 0x883   :  { %4699 = vmatmul.mubr.msk.f32.vlgmr.msra.gmra.mrb[6].mxu0 %vm266_vm5, %v920_v47 }
 0x884   :  { %4703 = vmatprep.mubr.msk.f32.mxu0 %vm266_vm5, %v5368_v7  ;;  %4702 = vmatpush3.msra.mxu0 %v259_v55 }
 0x885   :  { %4716 = vmatprep.subr.mxu0 %v5134_v18 }
 0x88b   :  { %4704 = vmatmul.mubr.msk.f32.vlgmr.msra.gmra.mrb[6].mxu0 %vm266_vm5, %v5370_v11  ;;  %v1580_v11 = vpop.permute.xlu0 %1579 }
 0x88c   :  { %4718 = vmatprep.mubr.msk.f32.mxu0 %vm5135_vm4, %v5134_v18 }
 0x88f   :  { %v1500_v13 = vpop.permute.xlu0 %1499 }
 0x8df   :  { %v1256_v4 = vpop.xlane.xlu1 %1255 }
 0x8e0   :  { %5073 = vrcp.f32 %v1256_v4 }
 0x8e3   :  { %v1259_v42 = vpop.xlane.xlu1 %1258 }
 0x8e4   :  { %5075 = vrcp.f32 %v1259_v42 }
 0x8e7   :  { %v1265_v6 = vpop.permute.xlu1 %1264 }
 0x8e8   :  { %4717 = vmatpush3.msra.mxu0 %v1265_v6 }
 0x8e9   :  { %4726 = vmatprep.subr.mxu0 %v261_v5 }
 0x8ea   :  { %v5074_v7 = vpop.eup %5073 }
 0x8eb   :  { %v1262_v9 = vmul.f32 %v5074_v7, %v5070_v62  ;;  %v1578_v19 = vpop.permute.xlu1 %1577  ;;  %v1971_v7 = vld [vmem:[%s5835_s9 + $0x18] sm:$0xff] }
 0x8ed   :  { %4719 = vmatmul.mubr.msk.f32.vlgmr.msra.gmra.mrb[8].mxu0 %vm266_vm5, %v1262_v9 }
 0x8ee   :  { %v5076_v10 = vpop.eup %5075  ;;  %4727 = vmatpush3.msra.mxu0 %v261_v5  ;;  %v1969_v5 = vld [vmem:[%s5835_s9 + $0x8] sm:$0xff] }
 0x8ef   :  { %v1263_v12 = vmul.f32 %v5076_v10, %v5072_v0  ;;  %4736 = vmatprep.subr.mxu0 %v5134_v18  ;;  %v2062_v10 = vld [vmem:[%s5836_s11] sm:$0xff] }
 0x8f1   :  { %4724 = vmatmul.mubr.msk.f32.vlgmr.msra.gmra.mrb[18].mxu1 %vm266_vm5, %v1263_v12  ;;  %v2064_v12 = vld [vmem:[%s5836_s11 + $0x10] sm:$0xff] }
 0x8f2   :  { %4732 = vmatpush3.xpose.msk.msra.mxu1 %vm266_vm5, %v1502_v8  ;;  %4733 = vmatprep.mubr.msk.f32.mxu1 %vm5135_vm4, %v5134_v18  ;;  %v1970_v8 = vld [vmem:[%s5835_s9 + $0x10] sm:$0xff] }
 0x8f3   :  { %4741 = vmatprep.subr.mxu1 %v5134_v18  ;;  %v4966_v9 = vpack.c.bf16 %v1971_v7, %v1970_v8 }
 0x8f5   :  { %4734 = vmatmul.mubr.msk.f32.vlgmr.msra.gmra.mrb[20].mxu1 %vm266_vm5, %v1500_v13 }
 0x8f6   :  { %4743 = vmatprep.mubr.msk.f32.mxu1 %vm5135_vm4, %v5134_v18 }
 0x9c0   :  { %v1336_v14 = vpop.f32.mrb[8].mxu0 }
 0x9c1   :  { %v4720_v15 = vpop.f32.mrb[9].mxu0  ;;  %4728 = vmatprep.mubr.msk.f32.mxu0 %vm266_vm5, %v1336_v14  ;;  %v2065_v14 = vld [vmem:[%s5836_s11 + $0x18] sm:$0xff] }
 0x9c2   :  { %v4974_v15 = vpack.c.bf16 %v2065_v14, %v2064_v12  ;;  %v4399_v14 = vld [vmem:[%s5841_s13] ss:$0 sm:$0xff] }
 0x9c4   :  { %v1412_v16 = vpop.f32.mrb[18].mxu1 }
 0x9c5   :  { %v4725_v17 = vpop.f32.mrb[19].mxu1  ;;  %4729 = vmatmul.mubr.msk.f32.vlgmr.msra.gmra.mrb[6].mxu0 %vm266_vm5, %v1412_v16  ;;  %v2066_v16 = vld [vmem:[%s5836_s11 + $0x20] sm:$0xff] }
 0x9c6   :  { %4737 = vmatpush3.xpose.msk.msra.mxu0 %vm266_vm5, %v1580_v11  ;;  %4738 = vmatprep.mubr.msk.f32.mxu0 %vm5135_vm4, %v5134_v18  ;;  %v2063_v11 = vld [vmem:[%s5836_s11 + $0x8] sm:$0xff] }
 0x9c7   :  { %4746 = vmatprep.subr.mxu0 %v5134_v18  ;;  %v4970_v13 = vpack.c.bf16 %v2063_v11, %v2062_v10  ;;  %v2067_v17 = vld [vmem:[%s5836_s11 + $0x28] sm:$0xff] }
 0x9c8   :  { %v1573_v20 = vpop.f32.mrb[20].mxu1 }
 0x9c9   :  { %v4735_v21 = vpop.f32.mrb[21].mxu1  ;;  %4739 = vmatmul.mubr.msk.f32.vlgmr.msra.gmra.mrb[10].mxu0 %vm266_vm5, %v1578_v19  ;;  %v1655_v22 = vsel %vm266_vm5, %v1573_v20, -inf  ;;  %v4978_v19 = vpack.c.bf16 %v2067_v17, %v2066_v16 }
 0x9ca   :  { %1656 = vmax.xlane.f32.xlu0 %v1655_v22  ;;  %4748 = vmatprep.mubr.msk.f32.mxu0 %vm5135_vm4, %v5134_v18 }
 0xa57   :  { %v1657_v23 = vpop.xlane.xlu0 %1656 }
 0xa58   :  { %v1661_v24 = vsub.f32 %v1573_v20, %v1657_v23 }
 0xa5a   :  { %v1663_v25 = vmul.f32 1.442695, %v1661_v24 }
 0xa5c   :  { %5077 = vpow2.f32 %v1663_v25 }
 0xa66   :  { %v5078_v26 = vpop.eup %5077 }
 0xa67   :  { %v1667_v27 = vsel %vm266_vm5, %v5078_v26, 0.0 }
 0xa68   :  { %1668 = vadd.xlane.f32.xlu0 %v1667_v27  ;;  %v4391_v27 = vld [vmem:[%s5837_s7] ss:$0 sm:$0xff] }
 0xa9c   :  { %v1651_v28 = vpop.f32.mrb[10].mxu0 }
 0xa9d   :  { %v4740_v29 = vpop.f32.mrb[11].mxu0  ;;  %v1658_v30 = vsel %vm266_vm5, %v1651_v28, -inf }
 0xa9e   :  { %1659 = vmax.xlane.f32.xlu1 %v1658_v30 }
 0xaaf   :  { %1677 = vrot.lane.b32.xlu1 %v5306_v37, %s5848_s24 }
 0xaf5   :  { %v1669_v31 = vpop.xlane.xlu0 %1668 }
 0xaf6   :  { %5079 = vrcp.f32 %v1669_v31  ;;  %v4392_v31 = vld [vmem:[%s5838_s8] ss:$0 sm:$0xff] }
 0xb00   :  { %v5080_v35 = vpop.eup %5079 }
 0xb01   :  { %v1675_v41 = vmul.f32 %v5080_v35, %v5078_v26 }
 0xb2b   :  { %v1660_v34 = vpop.xlane.xlu1 %1659 }
 0xb2c   :  { %v1662_v36 = vsub.f32 %v1651_v28, %v1660_v34 }
 0xb2e   :  { %v1665_v39 = vmul.f32 1.442695, %v1662_v36 }
 0xb2f   :  { %v1678_v43 = vpop.permute.xlu1 %1677 }
 0xb30   :  { %5081 = vpow2.f32 %v1665_v39  ;;  %4742 = vmatpush3.msra.mxu1 %v1678_v43  ;;  %v2069_v43 = vld [vmem:[%s5836_s11 + $0x38] sm:$0xff] }
 0xb31   :  { %4744 = vmatmul.mubr.msk.f32.vlgmr.msra.gmra.mrb[22].mxu1 %vm266_vm5, %v1675_v41  ;;  %v2068_v41 = vld [vmem:[%s5836_s11 + $0x30] sm:$0xff] }
 0xb3a   :  { %v5082_v44 = vpop.eup %5081 }
 0xb3b   :  { %v1670_v45 = vsel %vm266_vm5, %v5082_v44, 0.0 }
 0xb3c   :  { %1671 = vadd.xlane.f32.xlu0 %v1670_v45  ;;  %v4393_v45 = vld [vmem:[%s5839_s10] ss:$0 sm:$0xff] }
 0xb52   :  { %1753 = vrot.lane.b32.xlu0 %v5310_v38, %s5848_s24 }
 0xbc9   :  { %v1672_v37 = vpop.xlane.xlu0 %1671 }
 0xbca   :  { %5083 = vrcp.f32 %v1672_v37 }
 0xbcd   :  { %v1754_v47 = vpop.permute.xlu0 %1753 }
 0xbce   :  { %4747 = vmatpush3.msra.mxu0 %v1754_v47 }
 0xbcf   :  { %4751 = vmatprep.subr.mxu0 %v262_v46 }
 0xbd4   :  { %v5084_v48 = vpop.eup %5083 }
 0xbd5   :  { %v1676_v49 = vmul.f32 %v5084_v48, %v5082_v44  ;;  %v4982_v44 = vpack.c.bf16 %v2069_v43, %v2068_v41 }
 0xbd7   :  { %4749 = vmatmul.mubr.msk.f32.vlgmr.msra.gmra.mrb[12].mxu0 %vm266_vm5, %v1676_v49 }
 0xbd8   :  { %4752 = vmatpush3.msra.mxu0 %v262_v46 }
 0xbd9   :  { %4971 = vmatprep.subr.bf16.mxu0 %v4970_v13 }
 0xc04   :  { %v1749_v50 = vpop.f32.mrb[22].mxu1 }
 0xc05   :  { %v4745_v51 = vpop.f32.mrb[23].mxu1  ;;  %4753 = vmatprep.mubr.msk.f32.mxu0 %vm266_vm5, %v1749_v50 }
 0xc06   :  { %v4396_v51 = vld [vmem:[%s5840_s12] ss:$0 sm:$0xff] }
 0xcaa   :  { %v1825_v40 = vpop.f32.mrb[12].mxu0 }
 0xcab   :  { %v4750_v38 = vpop.f32.mrb[13].mxu0  ;;  %4754 = vmatmul.mubr.msk.f32.vlgmr.msra.gmra.mrb[6].mxu0 %vm266_vm5, %v1825_v40 }
 0xcac   :  { %4973 = vmatpush3.bf16.msra.mxu0 %v4970_v13 }
 0xcad   :  { %4975 = vmatprep.subr.bf16.mxu0 %v4974_v15 }
 0xcb0   :  { %4977 = vmatpush3.bf16.msra.mxu0 %v4974_v15 }
 0xcb1   :  { %4979 = vmatprep.subr.bf16.mxu0 %v4978_v19 }
 0xcb4   :  { %4981 = vmatpush3.bf16.msra.mxu0 %v4978_v19  ;;  %v4400_v19 = vld [vmem:[%s5842_s14] ss:$0 sm:$0xff] }
 0xcb5   :  { %4983 = vmatprep.subr.bf16.mxu0 %v4982_v44 }
 0xcb8   :  { %4985 = vmatpush3.bf16.msra.mxu0 %v4982_v44 }
 0xcb9   :  { %4807 = vmatprep.subr.mxu0 %v5134_v18 }
 0xd7e   :  { %v4755_v53 = vpop.f32.mrb[6].mxu0 }
 0xd7f   :  { %v1920_v54 = vadd.f32 %v4755_v53, %v4390_v52  ;;  %v1901_v55 = vpop.f32.mrb[7].mxu0 }
 0xd80   :  { %v1919_v56 = vadd.f32 %v4390_v52, %v1901_v55 }
 0xd81   :  { %v1922_v57 = vadd.f32 %v1920_v54, %v5293_v33 }
 0xd82   :  { %v1921_v58 = vadd.f32 %v1919_v56, %v5291_v32  ;;  %v1968_v32 = vld [vmem:[%s5835_s9] sm:$0xff] }
 0xd83   :  { %v1928_v59 = vsel %vm175_vm3, %v1922_v57, 0.0  ;;  %v4962_v6 = vpack.c.bf16 %v1969_v5, %v1968_v32  ;;  %v4403_v32 = vld [vmem:[%s5830_s3 + $0x30] sm:$0xff]  ;;  %v4404_v5 = vld [vmem:[%s5830_s3 + $0x38] sm:$0xff] }
 0xd84   :  { %1929 = vadd.xlane.f32.xlu0 %v1928_v59  ;;  %v1925_v60 = vsel %vm175_vm3, %v1921_v58, 0.0 }
 0xd85   :  { %1926 = vadd.xlane.f32.xlu1 %v1925_v60  ;;  %4963 = vmatprep.subr.bf16.mxu1 %v4962_v6 }
 0xd86   :  { %4965 = vmatpush3.bf16.msra.mxu1 %v4962_v6  ;;  %v4990_v6 = vpack.c.bf16 %v4404_v5, %v4403_v32 }
 0xd87   :  { %4967 = vmatprep.subr.bf16.mxu1 %v4966_v9 }
 0xd8a   :  { %4969 = vmatpush3.bf16.msra.mxu1 %v4966_v9 }
 0xe11   :  { %v1930_v61 = vpop.xlane.xlu0 %1929 }
 0xe12   :  { %v1933_v62 = vmul.f32 0.03125, %v1930_v61  ;;  %v1927_v63 = vpop.xlane.xlu1 %1926 }
 0xe13   :  { %v1932_v0 = vmul.f32 0.03125, %v1927_v63 }
 0xe14   :  { %v1935_v1 = vsub.f32 %v1922_v57, %v1933_v62 }
 0xe15   :  { %v1934_v2 = vsub.f32 %v1921_v58, %v1932_v0 }
 0xe16   :  { %v1937_v3 = vmul.f32 %v1935_v1, %v1935_v1 }
 0xe17   :  { %v1936_v4 = vmul.f32 %v1934_v2, %v1934_v2 }
 0xe18   :  { %v1941_v42 = vsel %vm175_vm3, %v1937_v3, 0.0 }
 0xe19   :  { %1942 = vadd.xlane.f32.xlu0 %v1941_v42  ;;  %v1938_v33 = vsel %vm175_vm3, %v1936_v4, 0.0  ;;  %v4401_v4 = vld [vmem:[%s5830_s3 + $0x20] sm:$0xff]  ;;  %v4402_v42 = vld [vmem:[%s5830_s3 + $0x28] sm:$0xff] }
 0xe1a   :  { %1939 = vadd.xlane.f32.xlu1 %v1938_v33  ;;  %v4986_v33 = vpack.c.bf16 %v4402_v42, %v4401_v4 }
 0xe1c   :  { %4987 = vmatprep.subr.bf16.mxu1 %v4986_v33 }
 0xea6   :  { %v1943_v20 = vpop.xlane.xlu0 %1942 }
 0xea7   :  { %v1945_v21 = vmul.f32 0.03125, %v1943_v20  ;;  %v1940_v22 = vpop.xlane.xlu1 %1939 }
 0xea8   :  { %v1944_v23 = vmul.f32 0.03125, %v1940_v22 }
 0xea9   :  { %v1947_v24 = vadd.f32 1e-05, %v1945_v21 }
 0xeaa   :  { %v1946_v25 = vadd.f32 1e-05, %v1944_v23 }
 0xeab   :  { %5085 = vrsqrt.f32 %v1947_v24  ;;  %v4406_v24 = vld [vmem:[%s5832_s4 + $0x1] ss:$0 sm:$0xff]  ;;  %s5862_s4 = smov 112  }
 0xeac   :  { %5087 = vrsqrt.f32 %v1946_v25 }
 0xeb5   :  { %v5086_v26 = vpop.eup %5085 }
 0xeb6   :  { %v5088_v28 = vpop.eup %5087  ;;  %v1951_v29 = vmul.f32 %v5086_v26, %v1935_v1 }
 0xeb7   :  { %v1950_v30 = vmul.f32 %v5088_v28, %v1934_v2 }
 0xeb8   :  { %v1959_v34 = vmul.f32 %v4391_v27, %v1951_v29 }
 0xeb9   :  { %v1958_v35 = vmul.f32 %v4391_v27, %v1950_v30 }
 0xeba   :  { %v1967_v39 = vadd.f32 %v4392_v31, %v1959_v34 }
 0xebb   :  { %v1966_v36 = vadd.f32 %v4392_v31, %v1958_v35 }
 0xebd   :  { %4764 = vmatprep.mubr.msk.f32.mxu1 %vm175_vm3, %v1966_v36 }
 0xebe   :  { %4765 = vmatmul.mubr.msk.f32.vlgmr.msra.gmra.mrb[24].mxu1 %vm175_vm3, %v1967_v39 }
 0xebf   :  { %4989 = vmatpush3.bf16.msra.mxu1 %v4986_v33 }
 0xec0   :  { %4991 = vmatprep.subr.bf16.mxu1 %v4990_v6 }
 0xec3   :  { %4993 = vmatpush3.bf16.msra.mxu1 %v4990_v6 }
 0xec4   :  { %4797 = vmatprep.subr.mxu1 %v5134_v18 }
 0xf91   :  { %v4766_v37 = vpop.f32.mrb[24].mxu1 }
 0xf92   :  { %v2057_v46 = vadd.f32 %v4766_v37, %v4393_v45  ;;  %v2051_v47 = vpop.f32.mrb[25].mxu1 }
 0xf93   :  { %v2052_v48 = vadd.f32 %v4393_v45, %v2051_v47 }
 0xf94   :  { %v2061_v50 = vmax.f32 %v2057_v46, 0.0 }
 0xf95   :  { %v2060_v49 = vmax.f32 %v2052_v48, 0.0 }
 0xf97   :  { %4783 = vmatprep.mubr.msk.f32.mxu0 %vm82_vm0, %v2060_v49 }
 0xf98   :  { %4784 = vmatmul.mubr.msk.f32.vlgmr.msra.gmra.mrb[14].mxu0 %vm82_vm0, %v2061_v50 }
 0xf99   :  { %4809 = vmatprep.mubr.msk.f32.mxu0 %vm5135_vm4, %v5134_v18 }
0x106b   :  { %v4785_v40 = vpop.f32.mrb[14].mxu0 }
0x106c   :  { %v2155_v38 = vadd.f32 %v4785_v40, %v4396_v51  ;;  %v2149_v52 = vpop.f32.mrb[15].mxu0 }
0x106d   :  { %v2150_v53 = vadd.f32 %v4396_v51, %v2149_v52 }
0x106e   :  { %v2159_v54 = vadd.f32 %v2155_v38, %v1967_v39 }
0x106f   :  { %v2158_v55 = vadd.f32 %v2150_v53, %v1966_v36 }
0x1070   :  { %v2165_v56 = vsel %vm175_vm3, %v2159_v54, 0.0 }
0x1071   :  { %2166 = vadd.xlane.f32.xlu0 %v2165_v56  ;;  %v2162_v57 = vsel %vm175_vm3, %v2158_v55, 0.0 }
0x1072   :  { %2163 = vadd.xlane.f32.xlu1 %v2162_v57 }
0x10fe   :  { %v2167_v58 = vpop.xlane.xlu0 %2166 }
0x10ff   :  { %v2169_v59 = vmul.f32 0.03125, %v2167_v58  ;;  %v2164_v60 = vpop.xlane.xlu1 %2163 }
0x1100   :  { %v2168_v61 = vmul.f32 0.03125, %v2164_v60 }
0x1101   :  { %v2171_v62 = vsub.f32 %v2159_v54, %v2169_v59 }
0x1102   :  { %v2170_v63 = vsub.f32 %v2158_v55, %v2168_v61 }
0x1103   :  { %v2173_v0 = vmul.f32 %v2171_v62, %v2171_v62 }
0x1104   :  { %v2172_v1 = vmul.f32 %v2170_v63, %v2170_v63 }
0x1105   :  { %v2177_v2 = vsel %vm175_vm3, %v2173_v0, 0.0 }
0x1106   :  { %2178 = vadd.xlane.f32.xlu0 %v2177_v2  ;;  %v2174_v3 = vsel %vm175_vm3, %v2172_v1, 0.0 }
0x1107   :  { %2175 = vadd.xlane.f32.xlu1 %v2174_v3 }
0x1193   :  { %v2179_v8 = vpop.xlane.xlu0 %2178 }
0x1194   :  { %v2181_v7 = vmul.f32 0.03125, %v2179_v8  ;;  %v2176_v9 = vpop.xlane.xlu1 %2175 }
0x1195   :  { %v2180_v10 = vmul.f32 0.03125, %v2176_v9 }
0x1196   :  { %v2183_v11 = vadd.f32 1e-05, %v2181_v7 }
0x1197   :  { %v2182_v12 = vadd.f32 1e-05, %v2180_v10 }
0x1198   :  { %5089 = vrsqrt.f32 %v2183_v11 }
0x1199   :  { %5091 = vrsqrt.f32 %v2182_v12 }
0x11a2   :  { %v5090_v13 = vpop.eup %5089 }
0x11a3   :  { %v5092_v15 = vpop.eup %5091  ;;  %v2187_v16 = vmul.f32 %v5090_v13, %v2171_v62 }
0x11a4   :  { %v2186_v17 = vmul.f32 %v5092_v15, %v2170_v63 }
0x11a5   :  { %v2195_v20 = vmul.f32 %v4399_v14, %v2187_v16 }
0x11a6   :  { %v2194_v21 = vmul.f32 %v4399_v14, %v2186_v17 }
0x11a7   :  { %v5559_v23 = vadd.f32 %v4400_v19, %v2195_v20 }
0x11a8   :  { %v5557_v22 = vadd.f32 %v4400_v19, %v2194_v21 }
0x11aa   :  { %4794 = vmatprep.mubr.msk.f32.mxu1 %vm175_vm3, %v5557_v22 }
0x11ab   :  { %4795 = vmatmul.mubr.msk.f32.vlgmr.msra.gmra.mrb[26].mxu1 %vm175_vm3, %v5559_v23 }
0x11ac   :  { %4799 = vmatprep.mubr.msk.f32.mxu1 %vm5135_vm4, %v5134_v18 }
0x127e   :  { %v4796_v25 = vpop.f32.mrb[26].mxu1 }
0x127f   :  { %v5570_v26 = vadd.f32 %v4796_v25, %v4406_v24  ;;  %v2289_v27 = vpop.f32.mrb[27].mxu1 }
0x1280   :  { %v5572_v28 = vadd.f32 %v4406_v24, %v2289_v27 }
0x1281   :  { %2384 = vrot.lane.b32.xlu0 %v5570_v26, %s5136_s26  ;;  %v5589_v34 = vmul.f32 0.35355338, %v5570_v26 }
0x1282   :  { %2306 = vrot.lane.b32.xlu1 %v5572_v28, %s5136_s26  ;;  %v5580_v30 = vmul.f32 0.35355338, %v5572_v28  ;;  %s5863_s26 = smov 48  }
0x12f3   :  { %v2385_v31 = vpop.permute.xlu0 %2384 }
0x12f4   :  { %v2307_v29 = vpop.permute.xlu1 %2306 }
0x12f5   :  { %4798 = vmatpush3.xpose.msk.msra.mxu1 %vm266_vm5, %v2307_v29 }
0x12f6   :  { %4802 = vmatprep.subr.mxu1 %v5134_v18 }
0x12f8   :  { %4800 = vmatmul.mubr.msk.f32.vlgmr.msra.gmra.mrb[28].mxu1 %vm266_vm5, %v5580_v30 }
0x12f9   :  { %4803 = vmatpush3.xpose.msk.msra.mxu1 %vm266_vm5, %v2385_v31  ;;  %4804 = vmatprep.mubr.msk.f32.mxu1 %vm5135_vm4, %v5134_v18 }
0x12fa   :  { %4812 = vmatprep.subr.mxu1 %v5134_v18 }
0x12fc   :  { %4805 = vmatmul.mubr.msk.f32.vlgmr.msra.gmra.mrb[30].mxu1 %vm266_vm5, %v5589_v34 }
0x12fd   :  { %4814 = vmatprep.mubr.msk.f32.mxu1 %vm5135_vm4, %v5134_v18 }
0x13cb   :  { %v2379_v35 = vpop.f32.mrb[28].mxu1 }
0x13cc   :  { %v4801_v36 = vpop.f32.mrb[29].mxu1  ;;  %v2461_v44 = vsel %vm266_vm5, %v2379_v35, -inf }
0x13cf   :  { %v2457_v39 = vpop.f32.mrb[30].mxu1 }
0x13d0   :  { %v4806_v41 = vpop.f32.mrb[31].mxu1  ;;  %v2464_v43 = vsel %vm266_vm5, %v2457_v39, -inf }
0x13d1   :  { %2465 = vmax.xlane.f32.xlu1 %v2464_v43 }
0x13e2   :  { %2559 = vrot.lane.b32.xlu1 %v5570_v26, %s5137_s30 }
0x13e6   :  { %2713 = vrot.lane.b32.xlu1 %v5589_v34, %s5139_s19 }
0x140a   :  { %2462 = vmax.xlane.f32.xlu1 %v2461_v44 }
0x141b   :  { %2637 = vrot.lane.b32.xlu1 %v5572_v28, %s5138_s18 }
0x141f   :  { %2635 = vrot.lane.b32.xlu1 %v5580_v30, %s5139_s19 }
0x1423   :  { %3129 = vrot.lane.b32.xlu1 %v5572_v28, %s5140_s1 }
0x145e   :  { %v2466_v45 = vpop.xlane.xlu1 %2465 }
0x145f   :  { %v2468_v37 = vsub.f32 %v2457_v39, %v2466_v45 }
0x1461   :  { %v2471_v46 = vmul.f32 1.442695, %v2468_v37 }
0x1462   :  { %v2560_v47 = vpop.permute.xlu1 %2559 }
0x1463   :  { %5093 = vpow2.f32 %v2471_v46  ;;  %4813 = vmatpush3.msra.mxu1 %v2560_v47 }
0x1464   :  { %4822 = vmatprep.subr.mxu1 %v5134_v18 }
0x1466   :  { %v2714_v50 = vpop.permute.xlu1 %2713 }
0x146d   :  { %v5094_v48 = vpop.eup %5093 }
0x146e   :  { %v2476_v49 = vsel %vm266_vm5, %v5094_v48, 0.0 }
0x146f   :  { %2477 = vadd.xlane.f32.xlu0 %v2476_v49  ;;  %v4410_v49 = vld [vmem:[%s5833_s5 + $0x28] sm:$0xff] }
0x1485   :  { %2715 = vrot.lane.b32.xlu0 %v5570_v26, %s5138_s18  ;;  %s5865_s18 = smov 104  }
0x1497   :  { %v2463_v51 = vpop.xlane.xlu1 %2462 }
0x1498   :  { %v2467_v40 = vsub.f32 %v2379_v35, %v2463_v51 }
0x149a   :  { %v2469_v38 = vmul.f32 1.442695, %v2467_v40 }
0x149b   :  { %v2638_v61 = vpop.permute.xlu1 %2637 }
0x149c   :  { %5095 = vpow2.f32 %v2469_v38 }
0x149f   :  { %v2636_v63 = vpop.permute.xlu1 %2635 }
0x14a3   :  { %v3130_v13 = vpop.permute.xlu1 %3129 }
0x14a6   :  { %v5096_v52 = vpop.eup %5095 }
0x14a7   :  { %v2473_v53 = vsel %vm266_vm5, %v5096_v52, 0.0 }
0x14a8   :  { %2474 = vadd.xlane.f32.xlu0 %v2473_v53 }
0x14be   :  { %2483 = vrot.lane.b32.xlu0 %v5572_v28, %s5137_s30  ;;  %s5864_s30 = smov 72  }
0x14fc   :  { %v2478_v54 = vpop.xlane.xlu0 %2477 }
0x14fd   :  { %5097 = vrcp.f32 %v2478_v54 }
0x1500   :  { %v2716_v57 = vpop.permute.xlu0 %2715 }
0x1507   :  { %v5098_v55 = vpop.eup %5097 }
0x1508   :  { %v2482_v56 = vmul.f32 %v5098_v55, %v5094_v48 }
0x150a   :  { %4815 = vmatmul.mubr.msk.f32.vlgmr.msra.gmra.mrb[32].mxu1 %vm266_vm5, %v2482_v56 }
0x150b   :  { %4823 = vmatpush3.xpose.msk.msra.mxu1 %vm266_vm5, %v2716_v57  ;;  %4824 = vmatprep.mubr.msk.f32.mxu1 %vm5135_vm4, %v5134_v18 }
0x150c   :  { %4832 = vmatprep.subr.mxu1 %v5134_v18 }
0x150e   :  { %4825 = vmatmul.mubr.msk.f32.vlgmr.msra.gmra.mrb[34].mxu1 %vm266_vm5, %v2714_v50  ;;  %v4409_v50 = vld [vmem:[%s5833_s5 + $0x20] sm:$0xff] }
0x150f   :  { %4834 = vmatprep.mubr.msk.f32.mxu1 %vm5135_vm4, %v5134_v18 }
0x1535   :  { %v2475_v58 = vpop.xlane.xlu0 %2474 }
0x1536   :  { %5099 = vrcp.f32 %v2475_v58 }
0x1539   :  { %v2484_v59 = vpop.permute.xlu0 %2483 }
0x153a   :  { %4808 = vmatpush3.msra.mxu0 %v2484_v59 }
0x153b   :  { %4817 = vmatprep.subr.mxu0 %v5134_v18 }
0x1540   :  { %v5100_v60 = vpop.eup %5099 }
0x1541   :  { %v2481_v62 = vmul.f32 %v5100_v60, %v5096_v52 }
0x1543   :  { %4810 = vmatmul.mubr.msk.f32.vlgmr.msra.gmra.mrb[16].mxu0 %vm266_vm5, %v2481_v62  ;;  %v4411_v62 = vld [vmem:[%s5833_s5 + $0x30] sm:$0xff] }
0x1544   :  { %4818 = vmatpush3.xpose.msk.msra.mxu0 %vm266_vm5, %v2638_v61  ;;  %4819 = vmatprep.mubr.msk.f32.mxu0 %vm5135_vm4, %v5134_v18 }
0x1545   :  { %4827 = vmatprep.subr.mxu0 %v5134_v18 }
0x1547   :  { %4820 = vmatmul.mubr.msk.f32.vlgmr.msra.gmra.mrb[18].mxu0 %vm266_vm5, %v2636_v63 }
0x1548   :  { %4829 = vmatprep.mubr.msk.f32.mxu0 %vm5135_vm4, %v5134_v18 }
0x15dd   :  { %v5632_v0 = vpop.f32.mrb[32].mxu1 }
0x15de   :  { %v4816_v1 = vpop.f32.mrb[33].mxu1 }
0x15e1   :  { %v2787_v2 = vpop.f32.mrb[34].mxu1 }
0x15e2   :  { %v4826_v3 = vpop.f32.mrb[35].mxu1  ;;  %v2794_v4 = vsel %vm266_vm5, %v2787_v2, -inf }
0x15e3   :  { %2795 = vmax.xlane.f32.xlu0 %v2794_v4 }
0x15f9   :  { %2889 = vrot.lane.b32.xlu0 %v5570_v26, %s5141_s20 }
0x15fd   :  { %3127 = vrot.lane.b32.xlu0 %v5580_v30, %s5862_s4 }
0x1601   :  { %3205 = vrot.lane.b32.xlu0 %v5589_v34, %s5862_s4 }
0x1616   :  { %v5641_v42 = vpop.f32.mrb[16].mxu0 }
0x1617   :  { %v4811_v33 = vpop.f32.mrb[17].mxu0 }
0x161a   :  { %v2709_v32 = vpop.f32.mrb[18].mxu0 }
0x161b   :  { %v4821_v5 = vpop.f32.mrb[19].mxu0  ;;  %v2791_v12 = vsel %vm266_vm5, %v2709_v32, -inf }
0x1670   :  { %v2796_v6 = vpop.xlane.xlu0 %2795 }
0x1671   :  { %v2798_v8 = vsub.f32 %v2787_v2, %v2796_v6 }
0x1673   :  { %v2801_v7 = vmul.f32 1.442695, %v2798_v8 }
0x1674   :  { %v2890_v9 = vpop.permute.xlu0 %2889 }
0x1675   :  { %5101 = vpow2.f32 %v2801_v7  ;;  %4833 = vmatpush3.msra.mxu1 %v2890_v9 }
0x1676   :  { %4847 = vmatprep.subr.mxu1 %v5134_v18 }
0x1678   :  { %v3128_v17 = vpop.permute.xlu0 %3127 }
0x167c   :  { %v3206_v20 = vpop.permute.xlu0 %3205 }
0x167f   :  { %v5102_v10 = vpop.eup %5101 }
0x1680   :  { %v2806_v11 = vsel %vm266_vm5, %v5102_v10, 0.0 }
0x1681   :  { %2807 = vadd.xlane.f32.xlu1 %v2806_v11 }
0x1692   :  { %3207 = vrot.lane.b32.xlu1 %v5570_v26, %s5140_s1 }
0x16b6   :  { %2792 = vmax.xlane.f32.xlu1 %v2791_v12 }
0x170e   :  { %v2808_v14 = vpop.xlane.xlu1 %2807 }
0x170f   :  { %5103 = vrcp.f32 %v2808_v14 }
0x1712   :  { %v3208_v19 = vpop.permute.xlu1 %3207 }
0x1719   :  { %v5104_v15 = vpop.eup %5103 }
0x171a   :  { %v2812_v16 = vmul.f32 %v5104_v15, %v5102_v10 }
0x171c   :  { %4835 = vmatmul.mubr.msk.f32.vlgmr.msra.gmra.mrb[36].mxu1 %vm266_vm5, %v2812_v16 }
0x171d   :  { %4848 = vmatpush3.xpose.msk.msra.mxu1 %vm266_vm5, %v3130_v13  ;;  %4849 = vmatprep.mubr.msk.f32.mxu1 %vm5135_vm4, %v5134_v18 }
0x171e   :  { %4852 = vmatprep.subr.mxu1 %v5134_v18 }
0x1720   :  { %4850 = vmatmul.mubr.msk.f32.vlgmr.msra.gmra.mrb[38].mxu1 %vm266_vm5, %v3128_v17 }
0x1721   :  { %4853 = vmatpush3.xpose.msk.msra.mxu1 %vm266_vm5, %v3208_v19  ;;  %4854 = vmatprep.mubr.msk.f32.mxu1 %vm5135_vm4, %v5134_v18 }
0x1722   :  { %4862 = vmatprep.subr.mxu1 %v5134_v18 }
0x1724   :  { %4855 = vmatmul.mubr.msk.f32.vlgmr.msra.gmra.mrb[40].mxu1 %vm266_vm5, %v3206_v20 }
0x1725   :  { %4864 = vmatprep.mubr.msk.f32.mxu1 %vm5135_vm4, %v5134_v18 }
0x1743   :  { %v2793_v21 = vpop.xlane.xlu1 %2792 }
0x1744   :  { %v2797_v24 = vsub.f32 %v2709_v32, %v2793_v21 }
0x1746   :  { %v2799_v25 = vmul.f32 1.442695, %v2797_v24 }
0x1748   :  { %5105 = vpow2.f32 %v2799_v25 }
0x1752   :  { %v5106_v27 = vpop.eup %5105 }
0x1753   :  { %v2803_v29 = vsel %vm266_vm5, %v5106_v27, 0.0 }
0x1754   :  { %2804 = vadd.xlane.f32.xlu0 %v2803_v29 }
0x176a   :  { %2813 = vrot.lane.b32.xlu0 %v5572_v28, %s5141_s20 }
0x176e   :  { %3381 = vrot.lane.b32.xlu0 %v5570_v26, %s5863_s26 }
0x1772   :  { %3542 = vrot.lane.b32.xlu0 %v5572_v28, %s5864_s30 }
0x1776   :  { %3620 = vrot.lane.b32.xlu0 %v5570_v26, %s5864_s30 }
0x177a   :  { %3540 = vrot.lane.b32.xlu0 %v5580_v30, %s5865_s18 }
0x17e1   :  { %v2805_v31 = vpop.xlane.xlu0 %2804 }
0x17e2   :  { %5107 = vrcp.f32 %v2805_v31 }
0x17e5   :  { %v2814_v35 = vpop.permute.xlu0 %2813 }
0x17e6   :  { %4828 = vmatpush3.msra.mxu0 %v2814_v35 }
0x17e7   :  { %4837 = vmatprep.subr.mxu0 %v4410_v49 }
0x17e9   :  { %v3382_v36 = vpop.permute.xlu0 %3381 }
0x17ea   :  { %4863 = vmatpush3.msra.mxu1 %v3382_v36 }
0x17eb   :  { %4872 = vmatprep.subr.mxu1 %v5134_v18 }
0x17ec   :  { %v5108_v39 = vpop.eup %5107 }
0x17ed   :  { %v2811_v41 = vmul.f32 %v5108_v39, %v5106_v27  ;;  %v3543_v1 = vpop.permute.xlu0 %3542  ;;  %v4412_v39 = vld [vmem:[%s5833_s5 + $0x38] sm:$0xff] }
0x17ef   :  { %4830 = vmatmul.mubr.msk.f32.vlgmr.msra.gmra.mrb[20].mxu0 %vm266_vm5, %v2811_v41  ;;  %v2961_v43 = vpop.f32.mrb[36].mxu1 }
0x17f0   :  { %v4836_v44 = vpop.f32.mrb[37].mxu1  ;;  %4838 = vmatpush3.msra.mxu0 %v4410_v49 }
0x17f1   :  { %4842 = vmatprep.subr.mxu0 %v4409_v50  ;;  %v3621_v4 = vpop.permute.xlu0 %3620 }
0x17f3   :  { %v3201_v45 = vpop.f32.mrb[38].mxu1 }
0x17f4   :  { %v4851_v37 = vpop.f32.mrb[39].mxu1  ;;  %v3283_v46 = vsel %vm266_vm5, %v3201_v45, -inf }
0x17f5   :  { %3284 = vmax.xlane.f32.xlu1 %v3283_v46  ;;  %v3541_v33 = vpop.permute.xlu0 %3540 }
0x17f7   :  { %v3279_v30 = vpop.f32.mrb[40].mxu1 }
0x17f8   :  { %v4856_v47 = vpop.f32.mrb[41].mxu1  ;;  %v3286_v48 = vsel %vm266_vm5, %v3279_v30, -inf }
0x17f9   :  { %3287 = vmax.xlane.f32.xlu1 %v3286_v48 }
0x1882   :  { %v3285_v51 = vpop.xlane.xlu1 %3284 }
0x1883   :  { %v3289_v40 = vsub.f32 %v3201_v45, %v3285_v51 }
0x1885   :  { %v3291_v38 = vmul.f32 1.442695, %v3289_v40 }
0x1886   :  { %v3288_v52 = vpop.xlane.xlu1 %3287 }
0x1887   :  { %5109 = vpow2.f32 %v3291_v38  ;;  %v3290_v53 = vsub.f32 %v3279_v30, %v3288_v52  ;;  %v4446_v30 = vld [vmem:[%s5834_s6 + $0x1] ss:$0 sm:$0xff] }
0x1889   :  { %v3293_v54 = vmul.f32 1.442695, %v3290_v53 }
0x188b   :  { %5111 = vpow2.f32 %v3293_v54 }
0x1891   :  { %v5110_v55 = vpop.eup %5109 }
0x1892   :  { %v3295_v56 = vsel %vm266_vm5, %v5110_v55, 0.0 }
0x1893   :  { %3296 = vadd.xlane.f32.xlu1 %v3295_v56 }
0x1895   :  { %v5112_v57 = vpop.eup %5111 }
0x1896   :  { %v3298_v58 = vsel %vm266_vm5, %v5112_v57, 0.0 }
0x1897   :  { %3299 = vadd.xlane.f32.xlu1 %v3298_v58 }
0x18a8   :  { %3305 = vrot.lane.b32.xlu1 %v5572_v28, %s5863_s26 }
0x18ac   :  { %3618 = vrot.lane.b32.xlu1 %v5589_v34, %s5865_s18 }
0x18c2   :  { %v2885_v59 = vpop.f32.mrb[20].mxu0 }
0x18c3   :  { %v4831_v60 = vpop.f32.mrb[21].mxu0  ;;  %4839 = vmatprep.mubr.msk.f32.mxu0 %vm266_vm5, %v2885_v59 }
0x18c4   :  { %4840 = vmatmul.mubr.msk.f32.vlgmr.msra.gmra.mrb[22].mxu0 %vm266_vm5, %v2961_v43 }
0x18c5   :  { %4844 = vmatprep.mubr.msk.f32.mxu0 %vm266_vm5, %v5641_v42  ;;  %4843 = vmatpush3.msra.mxu0 %v4409_v50 }
0x18c6   :  { %4857 = vmatprep.subr.mxu0 %v5134_v18 }
0x18cc   :  { %4845 = vmatmul.mubr.msk.f32.vlgmr.msra.gmra.mrb[22].mxu0 %vm266_vm5, %v5632_v0 }
0x18cd   :  { %4859 = vmatprep.mubr.msk.f32.mxu0 %vm5135_vm4, %v5134_v18 }
0x1920   :  { %v3297_v61 = vpop.xlane.xlu1 %3296 }
0x1921   :  { %5113 = vrcp.f32 %v3297_v61 }
0x1924   :  { %v3300_v34 = vpop.xlane.xlu1 %3299 }
0x1925   :  { %5115 = vrcp.f32 %v3300_v34  ;;  %v4452_v34 = vld [vmem:[%s5835_s9 + $0x28] sm:$0xff] }
0x1928   :  { %v3306_v63 = vpop.permute.xlu1 %3305 }
0x1929   :  { %4858 = vmatpush3.msra.mxu0 %v3306_v63  ;;  %v4453_v63 = vld [vmem:[%s5835_s9 + $0x30] sm:$0xff] }
0x192a   :  { %4867 = vmatprep.subr.mxu0 %v4411_v62 }
0x192b   :  { %v5114_v2 = vpop.eup %5113 }
0x192c   :  { %v3303_v3 = vmul.f32 %v5114_v2, %v5110_v55  ;;  %v3619_v7 = vpop.permute.xlu1 %3618 }
0x192e   :  { %4860 = vmatmul.mubr.msk.f32.vlgmr.msra.gmra.mrb[24].mxu0 %vm266_vm5, %v3303_v3  ;;  %v4459_v3 = vld [vmem:[%s5836_s11 + $0x40] sm:$0xff] }
0x192f   :  { %v5116_v0 = vpop.eup %5115  ;;  %4868 = vmatpush3.msra.mxu0 %v4411_v62 }
0x1930   :  { %v3304_v42 = vmul.f32 %v5116_v0, %v5112_v57  ;;  %4877 = vmatprep.subr.mxu0 %v5134_v18  ;;  %v4460_v0 = vld [vmem:[%s5836_s11 + $0x48] sm:$0xff] }
0x1932   :  { %4865 = vmatmul.mubr.msk.f32.vlgmr.msra.gmra.mrb[42].mxu1 %vm266_vm5, %v3304_v42  ;;  %v5002_v42 = vpack.c.bf16 %v4460_v0, %v4459_v3 }
0x1933   :  { %4873 = vmatpush3.xpose.msk.msra.mxu1 %vm266_vm5, %v3543_v1  ;;  %4874 = vmatprep.mubr.msk.f32.mxu1 %vm5135_vm4, %v5134_v18  ;;  %v4454_v1 = vld [vmem:[%s5835_s9 + $0x38] sm:$0xff] }
0x1934   :  { %4882 = vmatprep.subr.mxu1 %v5134_v18  ;;  %v4998_v2 = vpack.c.bf16 %v4454_v1, %v4453_v63 }
0x1936   :  { %4875 = vmatmul.mubr.msk.f32.vlgmr.msra.gmra.mrb[44].mxu1 %vm266_vm5, %v3541_v33  ;;  %v4462_v33 = vld [vmem:[%s5836_s11 + $0x58] sm:$0xff] }
0x1937   :  { %4884 = vmatprep.mubr.msk.f32.mxu1 %vm5135_vm4, %v5134_v18 }
0x1a01   :  { %v3377_v32 = vpop.f32.mrb[24].mxu0 }
0x1a02   :  { %v4861_v5 = vpop.f32.mrb[25].mxu0  ;;  %4869 = vmatprep.mubr.msk.f32.mxu0 %vm266_vm5, %v3377_v32 }
0x1a03   :  { %v4463_v5 = vld [vmem:[%s5836_s11 + $0x60] sm:$0xff] }
0x1a05   :  { %v3453_v6 = vpop.f32.mrb[42].mxu1 }
0x1a06   :  { %v4866_v8 = vpop.f32.mrb[43].mxu1  ;;  %4870 = vmatmul.mubr.msk.f32.vlgmr.msra.gmra.mrb[22].mxu0 %vm266_vm5, %v3453_v6  ;;  %v4464_v6 = vld [vmem:[%s5836_s11 + $0x68] sm:$0xff] }
0x1a07   :  { %4878 = vmatpush3.xpose.msk.msra.mxu0 %vm266_vm5, %v3621_v4  ;;  %4879 = vmatprep.mubr.msk.f32.mxu0 %vm5135_vm4, %v5134_v18  ;;  %v4461_v4 = vld [vmem:[%s5836_s11 + $0x50] sm:$0xff]  ;;  %v5010_v8 = vpack.c.bf16 %v4464_v6, %v4463_v5  ;;  %v4474_v6 = vld [vmem:[%s5842_s14 + $0x1] ss:$0 sm:$0xff] }
0x1a08   :  { %4887 = vmatprep.subr.mxu0 %v5134_v18  ;;  %v5006_v32 = vpack.c.bf16 %v4462_v33, %v4461_v4 }
0x1a09   :  { %v3614_v9 = vpop.f32.mrb[44].mxu1 }
0x1a0a   :  { %v4876_v10 = vpop.f32.mrb[45].mxu1  ;;  %4880 = vmatmul.mubr.msk.f32.vlgmr.msra.gmra.mrb[26].mxu0 %vm266_vm5, %v3619_v7  ;;  %v3696_v11 = vsel %vm266_vm5, %v3614_v9, -inf }
0x1a0b   :  { %3697 = vmax.xlane.f32.xlu0 %v3696_v11  ;;  %4889 = vmatprep.mubr.msk.f32.mxu0 %vm5135_vm4, %v5134_v18 }
0x1a98   :  { %v3698_v12 = vpop.xlane.xlu0 %3697 }
0x1a99   :  { %v3702_v13 = vsub.f32 %v3614_v9, %v3698_v12 }
0x1a9b   :  { %v3704_v14 = vmul.f32 1.442695, %v3702_v13 }
0x1a9d   :  { %5117 = vpow2.f32 %v3704_v14 }
0x1aa7   :  { %v5118_v15 = vpop.eup %5117 }
0x1aa8   :  { %v3708_v16 = vsel %vm266_vm5, %v5118_v15, 0.0 }
0x1aa9   :  { %3709 = vadd.xlane.f32.xlu0 %v3708_v16 }
0x1add   :  { %v3692_v17 = vpop.f32.mrb[26].mxu0 }
0x1ade   :  { %v4881_v19 = vpop.f32.mrb[27].mxu0  ;;  %v3699_v20 = vsel %vm266_vm5, %v3692_v17, -inf }
0x1adf   :  { %3700 = vmax.xlane.f32.xlu1 %v3699_v20  ;;  %v4450_v20 = vld [vmem:[%s5838_s8 + $0x1] ss:$0 sm:$0xff] }
0x1af0   :  { %3718 = vrot.lane.b32.xlu1 %v5572_v28, %s5866_s0 }
0x1b36   :  { %v3710_v21 = vpop.xlane.xlu0 %3709 }
0x1b37   :  { %5119 = vrcp.f32 %v3710_v21 }
0x1b41   :  { %v5120_v18 = vpop.eup %5119 }
0x1b42   :  { %v3716_v29 = vmul.f32 %v5120_v18, %v5118_v15  ;;  %v4449_v15 = vld [vmem:[%s5837_s7 + $0x1] ss:$0 sm:$0xff] }
0x1b6c   :  { %v3701_v24 = vpop.xlane.xlu1 %3700 }
0x1b6d   :  { %v3703_v25 = vsub.f32 %v3692_v17, %v3701_v24 }
0x1b6f   :  { %v3706_v27 = vmul.f32 1.442695, %v3703_v25 }
0x1b70   :  { %v3719_v31 = vpop.permute.xlu1 %3718 }
0x1b71   :  { %5121 = vpow2.f32 %v3706_v27  ;;  %4883 = vmatpush3.msra.mxu1 %v3719_v31  ;;  %v4465_v27 = vld [vmem:[%s5836_s11 + $0x70] sm:$0xff] }
0x1b72   :  { %4885 = vmatmul.mubr.msk.f32.vlgmr.msra.gmra.mrb[46].mxu1 %vm266_vm5, %v3716_v29  ;;  %v4466_v29 = vld [vmem:[%s5836_s11 + $0x78] sm:$0xff] }
0x1b73   :  { %v5014_v31 = vpack.c.bf16 %v4466_v29, %v4465_v27 }
0x1b7b   :  { %v5122_v35 = vpop.eup %5121 }
0x1b7c   :  { %v3711_v36 = vsel %vm266_vm5, %v5122_v35, 0.0 }
0x1b7d   :  { %3712 = vadd.xlane.f32.xlu0 %v3711_v36 }
0x1b93   :  { %3794 = vrot.lane.b32.xlu0 %v5570_v26, %s5866_s0 }
0x1c0a   :  { %v3713_v28 = vpop.xlane.xlu0 %3712 }
0x1c0b   :  { %5123 = vrcp.f32 %v3713_v28 }
0x1c0e   :  { %v3795_v41 = vpop.permute.xlu0 %3794 }
0x1c0f   :  { %4888 = vmatpush3.msra.mxu0 %v3795_v41 }
0x1c10   :  { %4892 = vmatprep.subr.mxu0 %v4412_v39 }
0x1c15   :  { %v5124_v43 = vpop.eup %5123 }
0x1c16   :  { %v3717_v44 = vmul.f32 %v5124_v43, %v5122_v35  ;;  %v4456_v35 = vld [vmem:[%s5839_s10 + $0x1] ss:$0 sm:$0xff] }
0x1c18   :  { %4890 = vmatmul.mubr.msk.f32.vlgmr.msra.gmra.mrb[28].mxu0 %vm266_vm5, %v3717_v44 }
0x1c19   :  { %4893 = vmatpush3.msra.mxu0 %v4412_v39 }
0x1c1a   :  { %5003 = vmatprep.subr.bf16.mxu0 %v5002_v42 }
0x1c45   :  { %v3790_v45 = vpop.f32.mrb[46].mxu1 }
0x1c46   :  { %v4886_v37 = vpop.f32.mrb[47].mxu1  ;;  %4894 = vmatprep.mubr.msk.f32.mxu0 %vm266_vm5, %v3790_v45  ;;  %v4468_v45 = vld [vmem:[%s5840_s12 + $0x1] ss:$0 sm:$0xff] }
0x1ceb   :  { %v3866_v46 = vpop.f32.mrb[28].mxu0 }
0x1cec   :  { %v4891_v26 = vpop.f32.mrb[29].mxu0  ;;  %4895 = vmatmul.mubr.msk.f32.vlgmr.msra.gmra.mrb[22].mxu0 %vm266_vm5, %v3866_v46 }
0x1ced   :  { %5005 = vmatpush3.bf16.msra.mxu0 %v5002_v42  ;;  %v4473_v42 = vld [vmem:[%s5841_s13 + $0x1] ss:$0 sm:$0xff] }
0x1cee   :  { %5007 = vmatprep.subr.bf16.mxu0 %v5006_v32 }
0x1cf1   :  { %5009 = vmatpush3.bf16.msra.mxu0 %v5006_v32 }
0x1cf2   :  { %5011 = vmatprep.subr.bf16.mxu0 %v5010_v8 }
0x1cf5   :  { %5013 = vmatpush3.bf16.msra.mxu0 %v5010_v8 }
0x1cf6   :  { %5015 = vmatprep.subr.bf16.mxu0 %v5014_v31 }
0x1cf9   :  { %5017 = vmatpush3.bf16.msra.mxu0 %v5014_v31 }
0x1dbf   :  { %v4896_v47 = vpop.f32.mrb[22].mxu0 }
0x1dc0   :  { %v3962_v48 = vadd.f32 %v4896_v47, %v4446_v30  ;;  %v3942_v49 = vpop.f32.mrb[23].mxu0 }
0x1dc1   :  { %v3961_v50 = vadd.f32 %v4446_v30, %v3942_v49 }
0x1dc2   :  { %v3964_v51 = vadd.f32 %v3962_v48, %v5559_v23 }
0x1dc3   :  { %v3963_v40 = vadd.f32 %v3961_v50, %v5557_v22  ;;  %v4451_v22 = vld [vmem:[%s5835_s9 + $0x20] sm:$0xff] }
0x1dc4   :  { %v3972_v38 = vsel %vm175_vm3, %v3964_v51, 0.0  ;;  %v4994_v62 = vpack.c.bf16 %v4452_v34, %v4451_v22  ;;  %v4256_v22 = vld [vmem:[%s5843_s15 + $0x18] sm:$0xff] }
0x1dc5   :  { %3973 = vadd.xlane.f32.xlu0 %v3972_v38  ;;  %v3969_v52 = vsel %vm175_vm3, %v3963_v40, 0.0 }
0x1dc6   :  { %3970 = vadd.xlane.f32.xlu1 %v3969_v52  ;;  %4995 = vmatprep.subr.bf16.mxu1 %v4994_v62 }
0x1dc7   :  { %4997 = vmatpush3.bf16.msra.mxu1 %v4994_v62 }
0x1dc8   :  { %4999 = vmatprep.subr.bf16.mxu1 %v4998_v2 }
0x1dcb   :  { %5001 = vmatpush3.bf16.msra.mxu1 %v4998_v2 }
0x1e52   :  { %v3974_v53 = vpop.xlane.xlu0 %3973 }
0x1e53   :  { %v3976_v54 = vmul.f32 0.03125, %v3974_v53  ;;  %v3971_v55 = vpop.xlane.xlu1 %3970 }
0x1e54   :  { %v3975_v56 = vmul.f32 0.03125, %v3971_v55 }
0x1e55   :  { %v3978_v57 = vsub.f32 %v3964_v51, %v3976_v54 }
0x1e56   :  { %v3977_v58 = vsub.f32 %v3963_v40, %v3975_v56 }
0x1e57   :  { %v3980_v59 = vmul.f32 %v3978_v57, %v3978_v57 }
0x1e58   :  { %v3979_v60 = vmul.f32 %v3977_v58, %v3977_v58 }
0x1e59   :  { %v3984_v61 = vsel %vm175_vm3, %v3980_v59, 0.0  ;;  %v4253_v59 = vld [vmem:[%s5843_s15] sm:$0xff] }
0x1e5a   :  { %3985 = vadd.xlane.f32.xlu0 %v3984_v61  ;;  %v3981_v23 = vsel %vm175_vm3, %v3979_v60, 0.0  ;;  %v4254_v60 = vld [vmem:[%s5843_s15 + $0x8] sm:$0xff] }
0x1e5b   :  { %3982 = vadd.xlane.f32.xlu1 %v3981_v23  ;;  %v5018_v61 = vpack.c.bf16 %v4254_v60, %v4253_v59  ;;  %v4255_v23 = vld [vmem:[%s5843_s15 + $0x10] sm:$0xff] }
0x1e5c   :  { %v5022_v34 = vpack.c.bf16 %v4256_v22, %v4255_v23 }
0x1e5d   :  { %5019 = vmatprep.subr.bf16.mxu1 %v5018_v61 }
0x1ee7   :  { %v3986_v7 = vpop.xlane.xlu0 %3985 }
0x1ee8   :  { %v3988_v9 = vmul.f32 0.03125, %v3986_v7  ;;  %v3983_v10 = vpop.xlane.xlu1 %3982 }
0x1ee9   :  { %v3987_v11 = vmul.f32 0.03125, %v3983_v10 }
0x1eea   :  { %v3990_v12 = vadd.f32 1e-05, %v3988_v9 }
0x1eeb   :  { %v3989_v13 = vadd.f32 1e-05, %v3987_v11  ;;  %v4475_v11 = vld [vmem:[%s5844_s16] ss:$0 sm:$0xff] }
0x1eec   :  { %5125 = vrsqrt.f32 %v3990_v12 }
0x1eed   :  { %5127 = vrsqrt.f32 %v3989_v13 }
0x1ef6   :  { %v5126_v14 = vpop.eup %5125 }
0x1ef7   :  { %v5128_v16 = vpop.eup %5127  ;;  %v3994_v17 = vmul.f32 %v5126_v14, %v3978_v57 }
0x1ef8   :  { %v3993_v19 = vmul.f32 %v5128_v16, %v3977_v58 }
0x1ef9   :  { %v4002_v21 = vmul.f32 %v4449_v15, %v3994_v17 }
0x1efa   :  { %v4001_v24 = vmul.f32 %v4449_v15, %v3993_v19 }
0x1efb   :  { %v4010_v25 = vadd.f32 %v4450_v20, %v4002_v21 }
0x1efc   :  { %v4009_v18 = vadd.f32 %v4450_v20, %v4001_v24 }
0x1efe   :  { %4905 = vmatprep.mubr.msk.f32.mxu1 %vm175_vm3, %v4009_v18 }
0x1eff   :  { %4906 = vmatmul.mubr.msk.f32.vlgmr.msra.gmra.mrb[48].mxu1 %vm175_vm3, %v4010_v25 }
0x1f00   :  { %5021 = vmatpush3.bf16.msra.mxu1 %v5018_v61 }
0x1f01   :  { %5023 = vmatprep.subr.bf16.mxu1 %v5022_v34 }
0x1f04   :  { %5025 = vmatpush3.bf16.msra.mxu1 %v5022_v34 }
0x1fd2   :  { %v4907_v36 = vpop.f32.mrb[48].mxu1 }
0x1fd3   :  { %v4102_v28 = vadd.f32 %v4907_v36, %v4456_v35  ;;  %v4096_v39 = vpop.f32.mrb[49].mxu1 }
0x1fd4   :  { %v4097_v41 = vadd.f32 %v4456_v35, %v4096_v39 }
0x1fd5   :  { %v4106_v44 = vmax.f32 %v4102_v28, 0.0 }
0x1fd6   :  { %v4105_v43 = vmax.f32 %v4097_v41, 0.0 }
0x1fd8   :  { %4924 = vmatprep.mubr.msk.f32.mxu0 %vm82_vm0, %v4105_v43 }
0x1fd9   :  { %4925 = vmatmul.mubr.msk.f32.vlgmr.msra.gmra.mrb[30].mxu0 %vm82_vm0, %v4106_v44 }
0x20ac   :  { %v4926_v37 = vpop.f32.mrb[30].mxu0 }
0x20ad   :  { %v4202_v46 = vadd.f32 %v4926_v37, %v4468_v45  ;;  %v4196_v26 = vpop.f32.mrb[31].mxu0 }
0x20ae   :  { %v4197_v30 = vadd.f32 %v4468_v45, %v4196_v26 }
0x20af   :  { %v4206_v47 = vadd.f32 %v4202_v46, %v4010_v25 }
0x20b0   :  { %v4205_v48 = vadd.f32 %v4197_v30, %v4009_v18 }
0x20b1   :  { %v4214_v49 = vsel %vm175_vm3, %v4206_v47, 0.0 }
0x20b2   :  { %4215 = vadd.xlane.f32.xlu0 %v4214_v49  ;;  %v4211_v50 = vsel %vm175_vm3, %v4205_v48, 0.0 }
0x20b3   :  { %4212 = vadd.xlane.f32.xlu1 %v4211_v50 }
0x213f   :  { %v4216_v51 = vpop.xlane.xlu0 %4215 }
0x2140   :  { %v4218_v40 = vmul.f32 0.03125, %v4216_v51  ;;  %v4213_v38 = vpop.xlane.xlu1 %4212 }
0x2141   :  { %v4217_v52 = vmul.f32 0.03125, %v4213_v38 }
0x2142   :  { %v4220_v53 = vsub.f32 %v4206_v47, %v4218_v40 }
0x2143   :  { %v4219_v54 = vsub.f32 %v4205_v48, %v4217_v52 }
0x2144   :  { %v4222_v55 = vmul.f32 %v4220_v53, %v4220_v53 }
0x2145   :  { %v4221_v56 = vmul.f32 %v4219_v54, %v4219_v54 }
0x2146   :  { %v4226_v57 = vsel %vm175_vm3, %v4222_v55, 0.0 }
0x2147   :  { %4227 = vadd.xlane.f32.xlu0 %v4226_v57  ;;  %v4223_v58 = vsel %vm175_vm3, %v4221_v56, 0.0 }
0x2148   :  { %4224 = vadd.xlane.f32.xlu1 %v4223_v58 }
0x21d4   :  { %v4228_v62 = vpop.xlane.xlu0 %4227 }
0x21d5   :  { %v4230_v63 = vmul.f32 0.03125, %v4228_v62  ;;  %v4225_v1 = vpop.xlane.xlu1 %4224 }
0x21d6   :  { %v4229_v2 = vmul.f32 0.03125, %v4225_v1 }
0x21d7   :  { %v4232_v3 = vadd.f32 1e-05, %v4230_v63 }
0x21d8   :  { %v4231_v0 = vadd.f32 1e-05, %v4229_v2 }
0x21d9   :  { %5129 = vrsqrt.f32 %v4232_v3 }
0x21da   :  { %5131 = vrsqrt.f32 %v4231_v0 }
0x21e3   :  { %v5130_v4 = vpop.eup %5129 }
0x21e4   :  { %v5132_v33 = vpop.eup %5131  ;;  %v4236_v32 = vmul.f32 %v5130_v4, %v4220_v53 }
0x21e5   :  { %v4235_v5 = vmul.f32 %v5132_v33, %v4219_v54 }
0x21e6   :  { %v4244_v8 = vmul.f32 %v4473_v42, %v4236_v32 }
0x21e7   :  { %v4243_v7 = vmul.f32 %v4473_v42, %v4235_v5 }
0x21e8   :  { %v4252_v10 = vadd.f32 %v4474_v6, %v4244_v8 }
0x21e9   :  { %v4251_v9 = vadd.f32 %v4474_v6, %v4243_v7 }
0x21eb   :  { %4935 = vmatprep.mubr.msk.f32.mxu1 %vm175_vm3, %v4251_v9 }
0x21ec   :  { %4936 = vmatmul.mubr.msk.f32.vlgmr.msra.gmra.mrb[50].mxu1 %vm175_vm3, %v4252_v10 }
0x22bf   :  { %v4937_v12 = vpop.f32.mrb[50].mxu1 }
0x22c0   :  { %v4342_v13 = vadd.f32 %v4937_v12, %v4475_v11  ;;  %v4336_v14 = vpop.f32.mrb[51].mxu1 }
0x22c1   :  { %v4337_v15 = vadd.f32 %v4475_v11, %v4336_v14 }
0x22c2   :  { %4346 = vst [vmem:[%s5845_s17 + $0x8] sm:$0xff] %v4342_v13 }
0x22c3   :  { %4345 = vst [vmem:[%s5845_s17] sm:$0xff] %v4337_v15 }

</bundles_post_ra>
